<compile_context>
chip_gen: v7x
topology: tpu7x:2x2x1
jax: 0.10.0
libtpu: 0.0.40
codegen_flags: <defaults>
</compile_context>

<pallas_src>
import math

import jax
import jax.numpy as jnp
from jax import lax
from jax.experimental import pallas as pl
from jax.experimental.pallas import tpu as pltpu


# --------------------------- fused forward kernel ----------------------------
def _make_fused_forward_kernel(num_layers, seq_len, batch, hidden):
    """Builds a kernel computing: GRU stack -> LayerNorm(last step) -> Linear.

    Kernel args (all VMEM refs):
      x_ref:                     (S*B, F0)  time-major, flattened: row t*B + b
      per layer l (4 refs each): w_ih (F_l, 3H), w_hh (H, 3H), b_ih (1, 3H), b_hh (1, 3H)
      gamma_ref, beta_ref:       (1, H)
      w_out_ref:                 (H, O)
      b_out_ref:                 (1, O)
      out_ref:                   (B, O)
    """
    H = hidden

    def kernel(x_ref, *refs):
        layer_refs = refs[: 4 * num_layers]
        gamma_ref, beta_ref, w_out_ref, b_out_ref, out_ref = refs[4 * num_layers:]

        # Current layer's input sequence as a flat (S*B, F) f32 value.
        x_cur = x_ref[...].astype(jnp.float32)

        h_last = None
        for l in range(num_layers):
            w_ih, w_hh, b_ih, b_hh = layer_refs[4 * l: 4 * l + 4]
            last_layer = (l == num_layers - 1)

            # Hoisted input projection for the whole sequence: one MXU matmul,
            # b_ih folded in here (outside the recurrence).
            x_proj = (jnp.dot(x_cur, w_ih[...], preferred_element_type=jnp.float32)
                      + b_ih[...])                                    # (S*B, 3H)

            w_hh_v = w_hh[...]
            b_hh_v = b_hh[...]

            h = jnp.zeros((batch, H), jnp.float32)                    # h_0 = 0
            outs = []
            # Short fixed trip count: fully unrolled Python loop, static slices,
            # recurrent state carried purely in vregs.
            for t in range(seq_len):
                xp = x_proj[t * batch:(t + 1) * batch, :]             # (B, 3H)
                hp = (jnp.dot(h, w_hh_v, preferred_element_type=jnp.float32)
                      + b_hh_v)                                       # (B, 3H)

                r = jax.nn.sigmoid(xp[:, 0:H] + hp[:, 0:H])
                z = jax.nn.sigmoid(xp[:, H:2 * H] + hp[:, H:2 * H])
                n = jnp.tanh(xp[:, 2 * H:3 * H] + r * hp[:, 2 * H:3 * H])
                h = (1.0 - z) * n + z * h

                if not last_layer:
                    outs.append(h)

            if not last_layer:
                # Next layer's (time-major, flattened) input sequence — stays in vregs.
                x_cur = jnp.concatenate(outs, axis=0)                 # (S*B, H)
            h_last = h

        # LayerNorm (eps = 1e-5) on the final time step only, then Linear head.
        mean = jnp.mean(h_last, axis=-1, keepdims=True)
        var = jnp.mean((h_last - mean) ** 2, axis=-1, keepdims=True)
        x_hat = (h_last - mean) * lax.rsqrt(var + 1e-5)
        y = x_hat * gamma_ref[...] + beta_ref[...]
        out = jnp.dot(y, w_out_ref[...], preferred_element_type=jnp.float32) + b_out_ref[...]
        out_ref[...] = out.astype(out_ref.dtype)

    return kernel


# ------------------------------- full forward --------------------------------
def forward(x, params):
    """x: [batch, seq_len, input_size]  ->  [batch, output_size]."""
    B, S, F = x.shape
    H = params["ln_gamma"].shape[-1]
    O = params["w_out"].shape[-1]
    num_layers = len(params["gru_layers"])

    # Pad batch up to a multiple of 8 (sublane width) for aligned tiles.
    B_pad = ((B + 7) // 8) * 8
    if B_pad != B:
        x = jnp.pad(x, ((0, B_pad - B), (0, 0), (0, 0)))

    # Time-major, flattened: row t*B_pad + b  <->  (time t, batch b).
    x2d = jnp.transpose(x, (1, 0, 2)).reshape(S * B_pad, F)

    flat = []
    for layer in params["gru_layers"]:
        flat += [layer["w_ih"], layer["w_hh"], layer["b_ih"], layer["b_hh"]]

    vmem = pl.BlockSpec(memory_space=pltpu.MemorySpace.VMEM)
    n_in = 1 + len(flat) + 4

    out = pl.pallas_call(
        _make_fused_forward_kernel(num_layers, S, B_pad, H),
        out_shape=jax.ShapeDtypeStruct((B_pad, O), x.dtype),
        in_specs=[vmem] * n_in,
        out_specs=vmem,
    )(x2d, *flat, params["ln_gamma"], params["ln_beta"],
      params["w_out"], params["b_out"])

    return out[:B]


# ------------------------------ parameter init -------------------------------
def init_params(key, input_size, hidden_size, num_layers, output_size):
    """Deterministic init mirroring PyTorch's uniform(-1/sqrt(H), 1/sqrt(H)).

    Weights are stored gate-fused and pre-transposed for x @ W layout:
      w_ih: (in_features, 3H), w_hh: (H, 3H), biases: (1, 3H), gate order [r|z|n].
    """
    bound = 1.0 / math.sqrt(hidden_size)
    params = {"gru_layers": []}
    for layer in range(num_layers):
        in_f = input_size if layer == 0 else hidden_size
        key, k1, k2, k3, k4 = jax.random.split(key, 5)
        params["gru_layers"].append({
            "w_ih": jax.random.uniform(k1, (in_f, 3 * hidden_size), jnp.float32, -bound, bound),
            "w_hh": jax.random.uniform(k2, (hidden_size, 3 * hidden_size), jnp.float32, -bound, bound),
            "b_ih": jax.random.uniform(k3, (1, 3 * hidden_size), jnp.float32, -bound, bound),
            "b_hh": jax.random.uniform(k4, (1, 3 * hidden_size), jnp.float32, -bound, bound),
        })
    key, k5, k6 = jax.random.split(key, 3)
    params["ln_gamma"] = jnp.ones((1, hidden_size), jnp.float32)
    params["ln_beta"] = jnp.zeros((1, hidden_size), jnp.float32)
    params["w_out"] = jax.random.uniform(k5, (hidden_size, output_size), jnp.float32, -bound, bound)
    params["b_out"] = jax.random.uniform(k6, (1, output_size), jnp.float32, -bound, bound)
    return params


# --------------------------- pure-JAX reference check ------------------------
def reference_forward(x, params):
    B, S, _ = x.shape
    H = params["ln_gamma"].shape[-1]
    seq = jnp.transpose(x, (1, 0, 2)).astype(jnp.float32)   # (S, B, F)
    for layer in params["gru_layers"]:
        w_ih, w_hh, b_ih, b_hh = (layer["w_ih"], layer["w_hh"],
                                  layer["b_ih"], layer["b_hh"])

        def cell(h, x_t):
            xp = x_t @ w_ih + b_ih
            hp = h @ w_hh + b_hh
            r = jax.nn.sigmoid(xp[:, :H] + hp[:, :H])
            z = jax.nn.sigmoid(xp[:, H:2 * H] + hp[:, H:2 * H])
            n = jnp.tanh(xp[:, 2 * H:] + r * hp[:, 2 * H:])
            h_new = (1.0 - z) * n + z * h
            return h_new, h_new

        _, seq = lax.scan(cell, jnp.zeros((B, H), jnp.float32), seq)
    h_last = seq[-1]
    mean = jnp.mean(h_last, axis=-1, keepdims=True)
    var = jnp.mean((h_last - mean) ** 2, axis=-1, keepdims=True)
    x_hat = (h_last - mean) * lax.rsqrt(var + 1e-5)
    y = x_hat * params["ln_gamma"] + params["ln_beta"]
    return y @ params["w_out"] + params["b_out"]


if __name__ == "__main__":
    # ModelConfig(input_size=4, hidden_size=32, num_layers=2, output_size=5, dropout=0.0)
    batch, seq_len = 2, 8
    input_size, hidden_size, num_layers, output_size = 4, 32, 2, 5
    # TODO(synk): inter-layer dropout not implemented (config default 0.0 / eval mode).

    key = jax.random.PRNGKey(0)
    key, xk = jax.random.split(key)
    x = jax.random.normal(xk, (batch, seq_len, input_size), jnp.float32)

    params = init_params(key, input_size, hidden_size, num_layers, output_size)

    yhat = jax.jit(forward)(x, params)
    jax.block_until_ready(yhat)
    assert yhat.shape == (batch, output_size), yhat.shape

    ref = reference_forward(x, params)
    assert jnp.allclose(yhat, ref, atol=1e-4, rtol=1e-4), (yhat, ref)

    print("KERNEL_OK")
</pallas_src>

<mosaic_0001>
module attributes {stable_mosaic.version = 11 : i64} {
  func.func @kernel(%arg0: memref<64x4xf32, #tpu.memory_space<vmem>>, %arg1: memref<4x96xf32, #tpu.memory_space<vmem>>, %arg2: memref<32x96xf32, #tpu.memory_space<vmem>>, %arg3: memref<1x96xf32, #tpu.memory_space<vmem>>, %arg4: memref<1x96xf32, #tpu.memory_space<vmem>>, %arg5: memref<32x96xf32, #tpu.memory_space<vmem>>, %arg6: memref<32x96xf32, #tpu.memory_space<vmem>>, %arg7: memref<1x96xf32, #tpu.memory_space<vmem>>, %arg8: memref<1x96xf32, #tpu.memory_space<vmem>>, %arg9: memref<1x32xf32, #tpu.memory_space<vmem>>, %arg10: memref<1x32xf32, #tpu.memory_space<vmem>>, %arg11: memref<32x5xf32, #tpu.memory_space<vmem>>, %arg12: memref<1x5xf32, #tpu.memory_space<vmem>>, %arg13: memref<8x5xf32, #tpu.memory_space<vmem>>) attributes {dimension_semantics = [], scalar_prefetch = 0 : i64, scratch_operands = 0 : i64, tpu.core_type = #tpu.core_type<tc>} {
    %c0 = arith.constant 0 : index
    %c0_0 = arith.constant 0 : index
    %0 = vector.load %arg0[%c0, %c0_0] : memref<64x4xf32, #tpu.memory_space<vmem>>, vector<64x4xf32>
    %c0_1 = arith.constant 0 : index
    %c0_2 = arith.constant 0 : index
    %1 = vector.load %arg1[%c0_1, %c0_2] : memref<4x96xf32, #tpu.memory_space<vmem>>, vector<4x96xf32>
    %cst = arith.constant dense<0.000000e+00> : vector<64x96xf32>
    %2 = tpu.matmul %0, %1, %cst {dimension_numbers = #tpu.dot_dimension_numbers<[1], [0], [0], [1], [0, 0, 1, 1], [], []>} : vector<64x4xf32>, vector<4x96xf32>, vector<64x96xf32> -> vector<64x96xf32>
    %c0_3 = arith.constant 0 : index
    %c0_4 = arith.constant 0 : index
    %3 = vector.load %arg3[%c0_3, %c0_4] : memref<1x96xf32, #tpu.memory_space<vmem>>, vector<1x96xf32>
    %4 = vector.broadcast %3 : vector<1x96xf32> to vector<64x96xf32>
    %5 = arith.addf %2, %4 : vector<64x96xf32>
    %c0_5 = arith.constant 0 : index
    %c0_6 = arith.constant 0 : index
    %6 = vector.load %arg2[%c0_5, %c0_6] : memref<32x96xf32, #tpu.memory_space<vmem>>, vector<32x96xf32>
    %c0_7 = arith.constant 0 : index
    %c0_8 = arith.constant 0 : index
    %7 = vector.load %arg4[%c0_7, %c0_8] : memref<1x96xf32, #tpu.memory_space<vmem>>, vector<1x96xf32>
    %cst_9 = arith.constant 0.000000e+00 : f32
    %8 = vector.broadcast %cst_9 : f32 to vector<8x32xf32>
    %9 = vector.extract_strided_slice %5 {offsets = [0, 0], sizes = [8, 96], strides = [1, 1]} : vector<64x96xf32> to vector<8x96xf32>
    %cst_10 = arith.constant dense<0.000000e+00> : vector<8x96xf32>
    %10 = tpu.matmul %8, %6, %cst_10 {dimension_numbers = #tpu.dot_dimension_numbers<[1], [0], [0], [1], [0, 0, 1, 1], [], []>} : vector<8x32xf32>, vector<32x96xf32>, vector<8x96xf32> -> vector<8x96xf32>
    %11 = vector.broadcast %7 : vector<1x96xf32> to vector<8x96xf32>
    %12 = arith.addf %10, %11 : vector<8x96xf32>
    %13 = vector.extract_strided_slice %9 {offsets = [0, 0], sizes = [8, 32], strides = [1, 1]} : vector<8x96xf32> to vector<8x32xf32>
    %14 = vector.extract_strided_slice %12 {offsets = [0, 0], sizes = [8, 32], strides = [1, 1]} : vector<8x96xf32> to vector<8x32xf32>
    %15 = arith.addf %13, %14 : vector<8x32xf32>
    %16 = arith.negf %15 : vector<8x32xf32>
    %17 = math.exp %16 : vector<8x32xf32>
    %cst_11 = arith.constant 1.000000e+00 : f32
    %18 = vector.broadcast %cst_11 : f32 to vector<8x32xf32>
    %19 = arith.addf %18, %17 : vector<8x32xf32>
    %20 = arith.divf %18, %19 : vector<8x32xf32>
    %21 = vector.extract_strided_slice %9 {offsets = [0, 32], sizes = [8, 32], strides = [1, 1]} : vector<8x96xf32> to vector<8x32xf32>
    %22 = vector.extract_strided_slice %12 {offsets = [0, 32], sizes = [8, 32], strides = [1, 1]} : vector<8x96xf32> to vector<8x32xf32>
    %23 = arith.addf %21, %22 : vector<8x32xf32>
    %24 = arith.negf %23 : vector<8x32xf32>
    %25 = math.exp %24 : vector<8x32xf32>
    %cst_12 = arith.constant 1.000000e+00 : f32
    %26 = vector.broadcast %cst_12 : f32 to vector<8x32xf32>
    %27 = arith.addf %26, %25 : vector<8x32xf32>
    %28 = arith.divf %26, %27 : vector<8x32xf32>
    %29 = vector.extract_strided_slice %9 {offsets = [0, 64], sizes = [8, 32], strides = [1, 1]} : vector<8x96xf32> to vector<8x32xf32>
    %30 = vector.extract_strided_slice %12 {offsets = [0, 64], sizes = [8, 32], strides = [1, 1]} : vector<8x96xf32> to vector<8x32xf32>
    %31 = arith.mulf %20, %30 : vector<8x32xf32>
    %32 = arith.addf %29, %31 : vector<8x32xf32>
    %33 = math.tanh %32 : vector<8x32xf32>
    %cst_13 = arith.constant 1.000000e+00 : f32
    %34 = vector.broadcast %cst_13 : f32 to vector<8x32xf32>
    %35 = arith.subf %34, %28 : vector<8x32xf32>
    %36 = arith.mulf %35, %33 : vector<8x32xf32>
    %37 = arith.mulf %28, %8 : vector<8x32xf32>
    %38 = arith.addf %36, %37 : vector<8x32xf32>
    %39 = vector.extract_strided_slice %5 {offsets = [8, 0], sizes = [8, 96], strides = [1, 1]} : vector<64x96xf32> to vector<8x96xf32>
    %cst_14 = arith.constant dense<0.000000e+00> : vector<8x96xf32>
    %40 = tpu.matmul %38, %6, %cst_14 {dimension_numbers = #tpu.dot_dimension_numbers<[1], [0], [0], [1], [0, 0, 1, 1], [], []>} : vector<8x32xf32>, vector<32x96xf32>, vector<8x96xf32> -> vector<8x96xf32>
    %41 = vector.broadcast %7 : vector<1x96xf32> to vector<8x96xf32>
    %42 = arith.addf %40, %41 : vector<8x96xf32>
    %43 = vector.extract_strided_slice %39 {offsets = [0, 0], sizes = [8, 32], strides = [1, 1]} : vector<8x96xf32> to vector<8x32xf32>
    %44 = vector.extract_strided_slice %42 {offsets = [0, 0], sizes = [8, 32], strides = [1, 1]} : vector<8x96xf32> to vector<8x32xf32>
    %45 = arith.addf %43, %44 : vector<8x32xf32>
    %46 = arith.negf %45 : vector<8x32xf32>
    %47 = math.exp %46 : vector<8x32xf32>
    %cst_15 = arith.constant 1.000000e+00 : f32
    %48 = vector.broadcast %cst_15 : f32 to vector<8x32xf32>
    %49 = arith.addf %48, %47 : vector<8x32xf32>
    %50 = arith.divf %48, %49 : vector<8x32xf32>
    %51 = vector.extract_strided_slice %39 {offsets = [0, 32], sizes = [8, 32], strides = [1, 1]} : vector<8x96xf32> to vector<8x32xf32>
    %52 = vector.extract_strided_slice %42 {offsets = [0, 32], sizes = [8, 32], strides = [1, 1]} : vector<8x96xf32> to vector<8x32xf32>
    %53 = arith.addf %51, %52 : vector<8x32xf32>
    %54 = arith.negf %53 : vector<8x32xf32>
    %55 = math.exp %54 : vector<8x32xf32>
    %cst_16 = arith.constant 1.000000e+00 : f32
    %56 = vector.broadcast %cst_16 : f32 to vector<8x32xf32>
    %57 = arith.addf %56, %55 : vector<8x32xf32>
    %58 = arith.divf %56, %57 : vector<8x32xf32>
    %59 = vector.extract_strided_slice %39 {offsets = [0, 64], sizes = [8, 32], strides = [1, 1]} : vector<8x96xf32> to vector<8x32xf32>
    %60 = vector.extract_strided_slice %42 {offsets = [0, 64], sizes = [8, 32], strides = [1, 1]} : vector<8x96xf32> to vector<8x32xf32>
    %61 = arith.mulf %50, %60 : vector<8x32xf32>
    %62 = arith.addf %59, %61 : vector<8x32xf32>
    %63 = math.tanh %62 : vector<8x32xf32>
    %cst_17 = arith.constant 1.000000e+00 : f32
    %64 = vector.broadcast %cst_17 : f32 to vector<8x32xf32>
    %65 = arith.subf %64, %58 : vector<8x32xf32>
    %66 = arith.mulf %65, %63 : vector<8x32xf32>
    %67 = arith.mulf %58, %38 : vector<8x32xf32>
    %68 = arith.addf %66, %67 : vector<8x32xf32>
    %69 = vector.extract_strided_slice %5 {offsets = [16, 0], sizes = [8, 96], strides = [1, 1]} : vector<64x96xf32> to vector<8x96xf32>
    %cst_18 = arith.constant dense<0.000000e+00> : vector<8x96xf32>
    %70 = tpu.matmul %68, %6, %cst_18 {dimension_numbers = #tpu.dot_dimension_numbers<[1], [0], [0], [1], [0, 0, 1, 1], [], []>} : vector<8x32xf32>, vector<32x96xf32>, vector<8x96xf32> -> vector<8x96xf32>
    %71 = vector.broadcast %7 : vector<1x96xf32> to vector<8x96xf32>
    %72 = arith.addf %70, %71 : vector<8x96xf32>
    %73 = vector.extract_strided_slice %69 {offsets = [0, 0], sizes = [8, 32], strides = [1, 1]} : vector<8x96xf32> to vector<8x32xf32>
    %74 = vector.extract_strided_slice %72 {offsets = [0, 0], sizes = [8, 32], strides = [1, 1]} : vector<8x96xf32> to vector<8x32xf32>
    %75 = arith.addf %73, %74 : vector<8x32xf32>
    %76 = arith.negf %75 : vector<8x32xf32>
    %77 = math.exp %76 : vector<8x32xf32>
    %cst_19 = arith.constant 1.000000e+00 : f32
    %78 = vector.broadcast %cst_19 : f32 to vector<8x32xf32>
    %79 = arith.addf %78, %77 : vector<8x32xf32>
    %80 = arith.divf %78, %79 : vector<8x32xf32>
    %81 = vector.extract_strided_slice %69 {offsets = [0, 32], sizes = [8, 32], strides = [1, 1]} : vector<8x96xf32> to vector<8x32xf32>
    %82 = vector.extract_strided_slice %72 {offsets = [0, 32], sizes = [8, 32], strides = [1, 1]} : vector<8x96xf32> to vector<8x32xf32>
    %83 = arith.addf %81, %82 : vector<8x32xf32>
    %84 = arith.negf %83 : vector<8x32xf32>
    %85 = math.exp %84 : vector<8x32xf32>
    %cst_20 = arith.constant 1.000000e+00 : f32
    %86 = vector.broadcast %cst_20 : f32 to vector<8x32xf32>
    %87 = arith.addf %86, %85 : vector<8x32xf32>
    %88 = arith.divf %86, %87 : vector<8x32xf32>
    %89 = vector.extract_strided_slice %69 {offsets = [0, 64], sizes = [8, 32], strides = [1, 1]} : vector<8x96xf32> to vector<8x32xf32>
    %90 = vector.extract_strided_slice %72 {offsets = [0, 64], sizes = [8, 32], strides = [1, 1]} : vector<8x96xf32> to vector<8x32xf32>
    %91 = arith.mulf %80, %90 : vector<8x32xf32>
    %92 = arith.addf %89, %91 : vector<8x32xf32>
    %93 = math.tanh %92 : vector<8x32xf32>
    %cst_21 = arith.constant 1.000000e+00 : f32
    %94 = vector.broadcast %cst_21 : f32 to vector<8x32xf32>
    %95 = arith.subf %94, %88 : vector<8x32xf32>
    %96 = arith.mulf %95, %93 : vector<8x32xf32>
    %97 = arith.mulf %88, %68 : vector<8x32xf32>
    %98 = arith.addf %96, %97 : vector<8x32xf32>
    %99 = vector.extract_strided_slice %5 {offsets = [24, 0], sizes = [8, 96], strides = [1, 1]} : vector<64x96xf32> to vector<8x96xf32>
    %cst_22 = arith.constant dense<0.000000e+00> : vector<8x96xf32>
    %100 = tpu.matmul %98, %6, %cst_22 {dimension_numbers = #tpu.dot_dimension_numbers<[1], [0], [0], [1], [0, 0, 1, 1], [], []>} : vector<8x32xf32>, vector<32x96xf32>, vector<8x96xf32> -> vector<8x96xf32>
    %101 = vector.broadcast %7 : vector<1x96xf32> to vector<8x96xf32>
    %102 = arith.addf %100, %101 : vector<8x96xf32>
    %103 = vector.extract_strided_slice %99 {offsets = [0, 0], sizes = [8, 32], strides = [1, 1]} : vector<8x96xf32> to vector<8x32xf32>
    %104 = vector.extract_strided_slice %102 {offsets = [0, 0], sizes = [8, 32], strides = [1, 1]} : vector<8x96xf32> to vector<8x32xf32>
    %105 = arith.addf %103, %104 : vector<8x32xf32>
    %106 = arith.negf %105 : vector<8x32xf32>
    %107 = math.exp %106 : vector<8x32xf32>
    %cst_23 = arith.constant 1.000000e+00 : f32
    %108 = vector.broadcast %cst_23 : f32 to vector<8x32xf32>
    %109 = arith.addf %108, %107 : vector<8x32xf32>
    %110 = arith.divf %108, %109 : vector<8x32xf32>
    %111 = vector.extract_strided_slice %99 {offsets = [0, 32], sizes = [8, 32], strides = [1, 1]} : vector<8x96xf32> to vector<8x32xf32>
    %112 = vector.extract_strided_slice %102 {offsets = [0, 32], sizes = [8, 32], strides = [1, 1]} : vector<8x96xf32> to vector<8x32xf32>
    %113 = arith.addf %111, %112 : vector<8x32xf32>
    %114 = arith.negf %113 : vector<8x32xf32>
    %115 = math.exp %114 : vector<8x32xf32>
    %cst_24 = arith.constant 1.000000e+00 : f32
    %116 = vector.broadcast %cst_24 : f32 to vector<8x32xf32>
    %117 = arith.addf %116, %115 : vector<8x32xf32>
    %118 = arith.divf %116, %117 : vector<8x32xf32>
    %119 = vector.extract_strided_slice %99 {offsets = [0, 64], sizes = [8, 32], strides = [1, 1]} : vector<8x96xf32> to vector<8x32xf32>
    %120 = vector.extract_strided_slice %102 {offsets = [0, 64], sizes = [8, 32], strides = [1, 1]} : vector<8x96xf32> to vector<8x32xf32>
    %121 = arith.mulf %110, %120 : vector<8x32xf32>
    %122 = arith.addf %119, %121 : vector<8x32xf32>
    %123 = math.tanh %122 : vector<8x32xf32>
    %cst_25 = arith.constant 1.000000e+00 : f32
    %124 = vector.broadcast %cst_25 : f32 to vector<8x32xf32>
    %125 = arith.subf %124, %118 : vector<8x32xf32>
    %126 = arith.mulf %125, %123 : vector<8x32xf32>
    %127 = arith.mulf %118, %98 : vector<8x32xf32>
    %128 = arith.addf %126, %127 : vector<8x32xf32>
    %129 = vector.extract_strided_slice %5 {offsets = [32, 0], sizes = [8, 96], strides = [1, 1]} : vector<64x96xf32> to vector<8x96xf32>
    %cst_26 = arith.constant dense<0.000000e+00> : vector<8x96xf32>
    %130 = tpu.matmul %128, %6, %cst_26 {dimension_numbers = #tpu.dot_dimension_numbers<[1], [0], [0], [1], [0, 0, 1, 1], [], []>} : vector<8x32xf32>, vector<32x96xf32>, vector<8x96xf32> -> vector<8x96xf32>
    %131 = vector.broadcast %7 : vector<1x96xf32> to vector<8x96xf32>
    %132 = arith.addf %130, %131 : vector<8x96xf32>
    %133 = vector.extract_strided_slice %129 {offsets = [0, 0], sizes = [8, 32], strides = [1, 1]} : vector<8x96xf32> to vector<8x32xf32>
    %134 = vector.extract_strided_slice %132 {offsets = [0, 0], sizes = [8, 32], strides = [1, 1]} : vector<8x96xf32> to vector<8x32xf32>
    %135 = arith.addf %133, %134 : vector<8x32xf32>
    %136 = arith.negf %135 : vector<8x32xf32>
    %137 = math.exp %136 : vector<8x32xf32>
    %cst_27 = arith.constant 1.000000e+00 : f32
    %138 = vector.broadcast %cst_27 : f32 to vector<8x32xf32>
    %139 = arith.addf %138, %137 : vector<8x32xf32>
    %140 = arith.divf %138, %139 : vector<8x32xf32>
    %141 = vector.extract_strided_slice %129 {offsets = [0, 32], sizes = [8, 32], strides = [1, 1]} : vector<8x96xf32> to vector<8x32xf32>
    %142 = vector.extract_strided_slice %132 {offsets = [0, 32], sizes = [8, 32], strides = [1, 1]} : vector<8x96xf32> to vector<8x32xf32>
    %143 = arith.addf %141, %142 : vector<8x32xf32>
    %144 = arith.negf %143 : vector<8x32xf32>
    %145 = math.exp %144 : vector<8x32xf32>
    %cst_28 = arith.constant 1.000000e+00 : f32
    %146 = vector.broadcast %cst_28 : f32 to vector<8x32xf32>
    %147 = arith.addf %146, %145 : vector<8x32xf32>
    %148 = arith.divf %146, %147 : vector<8x32xf32>
    %149 = vector.extract_strided_slice %129 {offsets = [0, 64], sizes = [8, 32], strides = [1, 1]} : vector<8x96xf32> to vector<8x32xf32>
    %150 = vector.extract_strided_slice %132 {offsets = [0, 64], sizes = [8, 32], strides = [1, 1]} : vector<8x96xf32> to vector<8x32xf32>
    %151 = arith.mulf %140, %150 : vector<8x32xf32>
    %152 = arith.addf %149, %151 : vector<8x32xf32>
    %153 = math.tanh %152 : vector<8x32xf32>
    %cst_29 = arith.constant 1.000000e+00 : f32
    %154 = vector.broadcast %cst_29 : f32 to vector<8x32xf32>
    %155 = arith.subf %154, %148 : vector<8x32xf32>
    %156 = arith.mulf %155, %153 : vector<8x32xf32>
    %157 = arith.mulf %148, %128 : vector<8x32xf32>
    %158 = arith.addf %156, %157 : vector<8x32xf32>
    %159 = vector.extract_strided_slice %5 {offsets = [40, 0], sizes = [8, 96], strides = [1, 1]} : vector<64x96xf32> to vector<8x96xf32>
    %cst_30 = arith.constant dense<0.000000e+00> : vector<8x96xf32>
    %160 = tpu.matmul %158, %6, %cst_30 {dimension_numbers = #tpu.dot_dimension_numbers<[1], [0], [0], [1], [0, 0, 1, 1], [], []>} : vector<8x32xf32>, vector<32x96xf32>, vector<8x96xf32> -> vector<8x96xf32>
    %161 = vector.broadcast %7 : vector<1x96xf32> to vector<8x96xf32>
    %162 = arith.addf %160, %161 : vector<8x96xf32>
    %163 = vector.extract_strided_slice %159 {offsets = [0, 0], sizes = [8, 32], strides = [1, 1]} : vector<8x96xf32> to vector<8x32xf32>
    %164 = vector.extract_strided_slice %162 {offsets = [0, 0], sizes = [8, 32], strides = [1, 1]} : vector<8x96xf32> to vector<8x32xf32>
    %165 = arith.addf %163, %164 : vector<8x32xf32>
    %166 = arith.negf %165 : vector<8x32xf32>
    %167 = math.exp %166 : vector<8x32xf32>
    %cst_31 = arith.constant 1.000000e+00 : f32
    %168 = vector.broadcast %cst_31 : f32 to vector<8x32xf32>
    %169 = arith.addf %168, %167 : vector<8x32xf32>
    %170 = arith.divf %168, %169 : vector<8x32xf32>
    %171 = vector.extract_strided_slice %159 {offsets = [0, 32], sizes = [8, 32], strides = [1, 1]} : vector<8x96xf32> to vector<8x32xf32>
    %172 = vector.extract_strided_slice %162 {offsets = [0, 32], sizes = [8, 32], strides = [1, 1]} : vector<8x96xf32> to vector<8x32xf32>
    %173 = arith.addf %171, %172 : vector<8x32xf32>
    %174 = arith.negf %173 : vector<8x32xf32>
    %175 = math.exp %174 : vector<8x32xf32>
    %cst_32 = arith.constant 1.000000e+00 : f32
    %176 = vector.broadcast %cst_32 : f32 to vector<8x32xf32>
    %177 = arith.addf %176, %175 : vector<8x32xf32>
    %178 = arith.divf %176, %177 : vector<8x32xf32>
    %179 = vector.extract_strided_slice %159 {offsets = [0, 64], sizes = [8, 32], strides = [1, 1]} : vector<8x96xf32> to vector<8x32xf32>
    %180 = vector.extract_strided_slice %162 {offsets = [0, 64], sizes = [8, 32], strides = [1, 1]} : vector<8x96xf32> to vector<8x32xf32>
    %181 = arith.mulf %170, %180 : vector<8x32xf32>
    %182 = arith.addf %179, %181 : vector<8x32xf32>
    %183 = math.tanh %182 : vector<8x32xf32>
    %cst_33 = arith.constant 1.000000e+00 : f32
    %184 = vector.broadcast %cst_33 : f32 to vector<8x32xf32>
    %185 = arith.subf %184, %178 : vector<8x32xf32>
    %186 = arith.mulf %185, %183 : vector<8x32xf32>
    %187 = arith.mulf %178, %158 : vector<8x32xf32>
    %188 = arith.addf %186, %187 : vector<8x32xf32>
    %189 = vector.extract_strided_slice %5 {offsets = [48, 0], sizes = [8, 96], strides = [1, 1]} : vector<64x96xf32> to vector<8x96xf32>
    %cst_34 = arith.constant dense<0.000000e+00> : vector<8x96xf32>
    %190 = tpu.matmul %188, %6, %cst_34 {dimension_numbers = #tpu.dot_dimension_numbers<[1], [0], [0], [1], [0, 0, 1, 1], [], []>} : vector<8x32xf32>, vector<32x96xf32>, vector<8x96xf32> -> vector<8x96xf32>
    %191 = vector.broadcast %7 : vector<1x96xf32> to vector<8x96xf32>
    %192 = arith.addf %190, %191 : vector<8x96xf32>
    %193 = vector.extract_strided_slice %189 {offsets = [0, 0], sizes = [8, 32], strides = [1, 1]} : vector<8x96xf32> to vector<8x32xf32>
    %194 = vector.extract_strided_slice %192 {offsets = [0, 0], sizes = [8, 32], strides = [1, 1]} : vector<8x96xf32> to vector<8x32xf32>
    %195 = arith.addf %193, %194 : vector<8x32xf32>
    %196 = arith.negf %195 : vector<8x32xf32>
    %197 = math.exp %196 : vector<8x32xf32>
    %cst_35 = arith.constant 1.000000e+00 : f32
    %198 = vector.broadcast %cst_35 : f32 to vector<8x32xf32>
    %199 = arith.addf %198, %197 : vector<8x32xf32>
    %200 = arith.divf %198, %199 : vector<8x32xf32>
    %201 = vector.extract_strided_slice %189 {offsets = [0, 32], sizes = [8, 32], strides = [1, 1]} : vector<8x96xf32> to vector<8x32xf32>
    %202 = vector.extract_strided_slice %192 {offsets = [0, 32], sizes = [8, 32], strides = [1, 1]} : vector<8x96xf32> to vector<8x32xf32>
    %203 = arith.addf %201, %202 : vector<8x32xf32>
    %204 = arith.negf %203 : vector<8x32xf32>
    %205 = math.exp %204 : vector<8x32xf32>
    %cst_36 = arith.constant 1.000000e+00 : f32
    %206 = vector.broadcast %cst_36 : f32 to vector<8x32xf32>
    %207 = arith.addf %206, %205 : vector<8x32xf32>
    %208 = arith.divf %206, %207 : vector<8x32xf32>
    %209 = vector.extract_strided_slice %189 {offsets = [0, 64], sizes = [8, 32], strides = [1, 1]} : vector<8x96xf32> to vector<8x32xf32>
    %210 = vector.extract_strided_slice %192 {offsets = [0, 64], sizes = [8, 32], strides = [1, 1]} : vector<8x96xf32> to vector<8x32xf32>
    %211 = arith.mulf %200, %210 : vector<8x32xf32>
    %212 = arith.addf %209, %211 : vector<8x32xf32>
    %213 = math.tanh %212 : vector<8x32xf32>
    %cst_37 = arith.constant 1.000000e+00 : f32
    %214 = vector.broadcast %cst_37 : f32 to vector<8x32xf32>
    %215 = arith.subf %214, %208 : vector<8x32xf32>
    %216 = arith.mulf %215, %213 : vector<8x32xf32>
    %217 = arith.mulf %208, %188 : vector<8x32xf32>
    %218 = arith.addf %216, %217 : vector<8x32xf32>
    %219 = vector.extract_strided_slice %5 {offsets = [56, 0], sizes = [8, 96], strides = [1, 1]} : vector<64x96xf32> to vector<8x96xf32>
    %cst_38 = arith.constant dense<0.000000e+00> : vector<8x96xf32>
    %220 = tpu.matmul %218, %6, %cst_38 {dimension_numbers = #tpu.dot_dimension_numbers<[1], [0], [0], [1], [0, 0, 1, 1], [], []>} : vector<8x32xf32>, vector<32x96xf32>, vector<8x96xf32> -> vector<8x96xf32>
    %221 = vector.broadcast %7 : vector<1x96xf32> to vector<8x96xf32>
    %222 = arith.addf %220, %221 : vector<8x96xf32>
    %223 = vector.extract_strided_slice %219 {offsets = [0, 0], sizes = [8, 32], strides = [1, 1]} : vector<8x96xf32> to vector<8x32xf32>
    %224 = vector.extract_strided_slice %222 {offsets = [0, 0], sizes = [8, 32], strides = [1, 1]} : vector<8x96xf32> to vector<8x32xf32>
    %225 = arith.addf %223, %224 : vector<8x32xf32>
    %226 = arith.negf %225 : vector<8x32xf32>
    %227 = math.exp %226 : vector<8x32xf32>
    %cst_39 = arith.constant 1.000000e+00 : f32
    %228 = vector.broadcast %cst_39 : f32 to vector<8x32xf32>
    %229 = arith.addf %228, %227 : vector<8x32xf32>
    %230 = arith.divf %228, %229 : vector<8x32xf32>
    %231 = vector.extract_strided_slice %219 {offsets = [0, 32], sizes = [8, 32], strides = [1, 1]} : vector<8x96xf32> to vector<8x32xf32>
    %232 = vector.extract_strided_slice %222 {offsets = [0, 32], sizes = [8, 32], strides = [1, 1]} : vector<8x96xf32> to vector<8x32xf32>
    %233 = arith.addf %231, %232 : vector<8x32xf32>
    %234 = arith.negf %233 : vector<8x32xf32>
    %235 = math.exp %234 : vector<8x32xf32>
    %cst_40 = arith.constant 1.000000e+00 : f32
    %236 = vector.broadcast %cst_40 : f32 to vector<8x32xf32>
    %237 = arith.addf %236, %235 : vector<8x32xf32>
    %238 = arith.divf %236, %237 : vector<8x32xf32>
    %239 = vector.extract_strided_slice %219 {offsets = [0, 64], sizes = [8, 32], strides = [1, 1]} : vector<8x96xf32> to vector<8x32xf32>
    %240 = vector.extract_strided_slice %222 {offsets = [0, 64], sizes = [8, 32], strides = [1, 1]} : vector<8x96xf32> to vector<8x32xf32>
    %241 = arith.mulf %230, %240 : vector<8x32xf32>
    %242 = arith.addf %239, %241 : vector<8x32xf32>
    %243 = math.tanh %242 : vector<8x32xf32>
    %cst_41 = arith.constant 1.000000e+00 : f32
    %244 = vector.broadcast %cst_41 : f32 to vector<8x32xf32>
    %245 = arith.subf %244, %238 : vector<8x32xf32>
    %246 = arith.mulf %245, %243 : vector<8x32xf32>
    %247 = arith.mulf %238, %218 : vector<8x32xf32>
    %248 = arith.addf %246, %247 : vector<8x32xf32>
    %249 = tpu.concatenate %38, %68, %98, %128, %158, %188, %218, %248 in 0 : vector<8x32xf32>, vector<8x32xf32>, vector<8x32xf32>, vector<8x32xf32>, vector<8x32xf32>, vector<8x32xf32>, vector<8x32xf32>, vector<8x32xf32> -> vector<64x32xf32>
    %c0_42 = arith.constant 0 : index
    %c0_43 = arith.constant 0 : index
    %250 = vector.load %arg5[%c0_42, %c0_43] : memref<32x96xf32, #tpu.memory_space<vmem>>, vector<32x96xf32>
    %cst_44 = arith.constant dense<0.000000e+00> : vector<64x96xf32>
    %251 = tpu.matmul %249, %250, %cst_44 {dimension_numbers = #tpu.dot_dimension_numbers<[1], [0], [0], [1], [0, 0, 1, 1], [], []>} : vector<64x32xf32>, vector<32x96xf32>, vector<64x96xf32> -> vector<64x96xf32>
    %c0_45 = arith.constant 0 : index
    %c0_46 = arith.constant 0 : index
    %252 = vector.load %arg7[%c0_45, %c0_46] : memref<1x96xf32, #tpu.memory_space<vmem>>, vector<1x96xf32>
    %253 = vector.broadcast %252 : vector<1x96xf32> to vector<64x96xf32>
    %254 = arith.addf %251, %253 : vector<64x96xf32>
    %c0_47 = arith.constant 0 : index
    %c0_48 = arith.constant 0 : index
    %255 = vector.load %arg6[%c0_47, %c0_48] : memref<32x96xf32, #tpu.memory_space<vmem>>, vector<32x96xf32>
    %c0_49 = arith.constant 0 : index
    %c0_50 = arith.constant 0 : index
    %256 = vector.load %arg8[%c0_49, %c0_50] : memref<1x96xf32, #tpu.memory_space<vmem>>, vector<1x96xf32>
    %cst_51 = arith.constant 0.000000e+00 : f32
    %257 = vector.broadcast %cst_51 : f32 to vector<8x32xf32>
    %258 = vector.extract_strided_slice %254 {offsets = [0, 0], sizes = [8, 96], strides = [1, 1]} : vector<64x96xf32> to vector<8x96xf32>
    %cst_52 = arith.constant dense<0.000000e+00> : vector<8x96xf32>
    %259 = tpu.matmul %257, %255, %cst_52 {dimension_numbers = #tpu.dot_dimension_numbers<[1], [0], [0], [1], [0, 0, 1, 1], [], []>} : vector<8x32xf32>, vector<32x96xf32>, vector<8x96xf32> -> vector<8x96xf32>
    %260 = vector.broadcast %256 : vector<1x96xf32> to vector<8x96xf32>
    %261 = arith.addf %259, %260 : vector<8x96xf32>
    %262 = vector.extract_strided_slice %258 {offsets = [0, 0], sizes = [8, 32], strides = [1, 1]} : vector<8x96xf32> to vector<8x32xf32>
    %263 = vector.extract_strided_slice %261 {offsets = [0, 0], sizes = [8, 32], strides = [1, 1]} : vector<8x96xf32> to vector<8x32xf32>
    %264 = arith.addf %262, %263 : vector<8x32xf32>
    %265 = arith.negf %264 : vector<8x32xf32>
    %266 = math.exp %265 : vector<8x32xf32>
    %cst_53 = arith.constant 1.000000e+00 : f32
    %267 = vector.broadcast %cst_53 : f32 to vector<8x32xf32>
    %268 = arith.addf %267, %266 : vector<8x32xf32>
    %269 = arith.divf %267, %268 : vector<8x32xf32>
    %270 = vector.extract_strided_slice %258 {offsets = [0, 32], sizes = [8, 32], strides = [1, 1]} : vector<8x96xf32> to vector<8x32xf32>
    %271 = vector.extract_strided_slice %261 {offsets = [0, 32], sizes = [8, 32], strides = [1, 1]} : vector<8x96xf32> to vector<8x32xf32>
    %272 = arith.addf %270, %271 : vector<8x32xf32>
    %273 = arith.negf %272 : vector<8x32xf32>
    %274 = math.exp %273 : vector<8x32xf32>
    %cst_54 = arith.constant 1.000000e+00 : f32
    %275 = vector.broadcast %cst_54 : f32 to vector<8x32xf32>
    %276 = arith.addf %275, %274 : vector<8x32xf32>
    %277 = arith.divf %275, %276 : vector<8x32xf32>
    %278 = vector.extract_strided_slice %258 {offsets = [0, 64], sizes = [8, 32], strides = [1, 1]} : vector<8x96xf32> to vector<8x32xf32>
    %279 = vector.extract_strided_slice %261 {offsets = [0, 64], sizes = [8, 32], strides = [1, 1]} : vector<8x96xf32> to vector<8x32xf32>
    %280 = arith.mulf %269, %279 : vector<8x32xf32>
    %281 = arith.addf %278, %280 : vector<8x32xf32>
    %282 = math.tanh %281 : vector<8x32xf32>
    %cst_55 = arith.constant 1.000000e+00 : f32
    %283 = vector.broadcast %cst_55 : f32 to vector<8x32xf32>
    %284 = arith.subf %283, %277 : vector<8x32xf32>
    %285 = arith.mulf %284, %282 : vector<8x32xf32>
    %286 = arith.mulf %277, %257 : vector<8x32xf32>
    %287 = arith.addf %285, %286 : vector<8x32xf32>
    %288 = vector.extract_strided_slice %254 {offsets = [8, 0], sizes = [8, 96], strides = [1, 1]} : vector<64x96xf32> to vector<8x96xf32>
    %cst_56 = arith.constant dense<0.000000e+00> : vector<8x96xf32>
    %289 = tpu.matmul %287, %255, %cst_56 {dimension_numbers = #tpu.dot_dimension_numbers<[1], [0], [0], [1], [0, 0, 1, 1], [], []>} : vector<8x32xf32>, vector<32x96xf32>, vector<8x96xf32> -> vector<8x96xf32>
    %290 = vector.broadcast %256 : vector<1x96xf32> to vector<8x96xf32>
    %291 = arith.addf %289, %290 : vector<8x96xf32>
    %292 = vector.extract_strided_slice %288 {offsets = [0, 0], sizes = [8, 32], strides = [1, 1]} : vector<8x96xf32> to vector<8x32xf32>
    %293 = vector.extract_strided_slice %291 {offsets = [0, 0], sizes = [8, 32], strides = [1, 1]} : vector<8x96xf32> to vector<8x32xf32>
    %294 = arith.addf %292, %293 : vector<8x32xf32>
    %295 = arith.negf %294 : vector<8x32xf32>
    %296 = math.exp %295 : vector<8x32xf32>
    %cst_57 = arith.constant 1.000000e+00 : f32
    %297 = vector.broadcast %cst_57 : f32 to vector<8x32xf32>
    %298 = arith.addf %297, %296 : vector<8x32xf32>
    %299 = arith.divf %297, %298 : vector<8x32xf32>
    %300 = vector.extract_strided_slice %288 {offsets = [0, 32], sizes = [8, 32], strides = [1, 1]} : vector<8x96xf32> to vector<8x32xf32>
    %301 = vector.extract_strided_slice %291 {offsets = [0, 32], sizes = [8, 32], strides = [1, 1]} : vector<8x96xf32> to vector<8x32xf32>
    %302 = arith.addf %300, %301 : vector<8x32xf32>
    %303 = arith.negf %302 : vector<8x32xf32>
    %304 = math.exp %303 : vector<8x32xf32>
    %cst_58 = arith.constant 1.000000e+00 : f32
    %305 = vector.broadcast %cst_58 : f32 to vector<8x32xf32>
    %306 = arith.addf %305, %304 : vector<8x32xf32>
    %307 = arith.divf %305, %306 : vector<8x32xf32>
    %308 = vector.extract_strided_slice %288 {offsets = [0, 64], sizes = [8, 32], strides = [1, 1]} : vector<8x96xf32> to vector<8x32xf32>
    %309 = vector.extract_strided_slice %291 {offsets = [0, 64], sizes = [8, 32], strides = [1, 1]} : vector<8x96xf32> to vector<8x32xf32>
    %310 = arith.mulf %299, %309 : vector<8x32xf32>
    %311 = arith.addf %308, %310 : vector<8x32xf32>
    %312 = math.tanh %311 : vector<8x32xf32>
    %cst_59 = arith.constant 1.000000e+00 : f32
    %313 = vector.broadcast %cst_59 : f32 to vector<8x32xf32>
    %314 = arith.subf %313, %307 : vector<8x32xf32>
    %315 = arith.mulf %314, %312 : vector<8x32xf32>
    %316 = arith.mulf %307, %287 : vector<8x32xf32>
    %317 = arith.addf %315, %316 : vector<8x32xf32>
    %318 = vector.extract_strided_slice %254 {offsets = [16, 0], sizes = [8, 96], strides = [1, 1]} : vector<64x96xf32> to vector<8x96xf32>
    %cst_60 = arith.constant dense<0.000000e+00> : vector<8x96xf32>
    %319 = tpu.matmul %317, %255, %cst_60 {dimension_numbers = #tpu.dot_dimension_numbers<[1], [0], [0], [1], [0, 0, 1, 1], [], []>} : vector<8x32xf32>, vector<32x96xf32>, vector<8x96xf32> -> vector<8x96xf32>
    %320 = vector.broadcast %256 : vector<1x96xf32> to vector<8x96xf32>
    %321 = arith.addf %319, %320 : vector<8x96xf32>
    %322 = vector.extract_strided_slice %318 {offsets = [0, 0], sizes = [8, 32], strides = [1, 1]} : vector<8x96xf32> to vector<8x32xf32>
    %323 = vector.extract_strided_slice %321 {offsets = [0, 0], sizes = [8, 32], strides = [1, 1]} : vector<8x96xf32> to vector<8x32xf32>
    %324 = arith.addf %322, %323 : vector<8x32xf32>
    %325 = arith.negf %324 : vector<8x32xf32>
    %326 = math.exp %325 : vector<8x32xf32>
    %cst_61 = arith.constant 1.000000e+00 : f32
    %327 = vector.broadcast %cst_61 : f32 to vector<8x32xf32>
    %328 = arith.addf %327, %326 : vector<8x32xf32>
    %329 = arith.divf %327, %328 : vector<8x32xf32>
    %330 = vector.extract_strided_slice %318 {offsets = [0, 32], sizes = [8, 32], strides = [1, 1]} : vector<8x96xf32> to vector<8x32xf32>
    %331 = vector.extract_strided_slice %321 {offsets = [0, 32], sizes = [8, 32], strides = [1, 1]} : vector<8x96xf32> to vector<8x32xf32>
    %332 = arith.addf %330, %331 : vector<8x32xf32>
    %333 = arith.negf %332 : vector<8x32xf32>
    %334 = math.exp %333 : vector<8x32xf32>
    %cst_62 = arith.constant 1.000000e+00 : f32
    %335 = vector.broadcast %cst_62 : f32 to vector<8x32xf32>
    %336 = arith.addf %335, %334 : vector<8x32xf32>
    %337 = arith.divf %335, %336 : vector<8x32xf32>
    %338 = vector.extract_strided_slice %318 {offsets = [0, 64], sizes = [8, 32], strides = [1, 1]} : vector<8x96xf32> to vector<8x32xf32>
    %339 = vector.extract_strided_slice %321 {offsets = [0, 64], sizes = [8, 32], strides = [1, 1]} : vector<8x96xf32> to vector<8x32xf32>
    %340 = arith.mulf %329, %339 : vector<8x32xf32>
    %341 = arith.addf %338, %340 : vector<8x32xf32>
    %342 = math.tanh %341 : vector<8x32xf32>
    %cst_63 = arith.constant 1.000000e+00 : f32
    %343 = vector.broadcast %cst_63 : f32 to vector<8x32xf32>
    %344 = arith.subf %343, %337 : vector<8x32xf32>
    %345 = arith.mulf %344, %342 : vector<8x32xf32>
    %346 = arith.mulf %337, %317 : vector<8x32xf32>
    %347 = arith.addf %345, %346 : vector<8x32xf32>
    %348 = vector.extract_strided_slice %254 {offsets = [24, 0], sizes = [8, 96], strides = [1, 1]} : vector<64x96xf32> to vector<8x96xf32>
    %cst_64 = arith.constant dense<0.000000e+00> : vector<8x96xf32>
    %349 = tpu.matmul %347, %255, %cst_64 {dimension_numbers = #tpu.dot_dimension_numbers<[1], [0], [0], [1], [0, 0, 1, 1], [], []>} : vector<8x32xf32>, vector<32x96xf32>, vector<8x96xf32> -> vector<8x96xf32>
    %350 = vector.broadcast %256 : vector<1x96xf32> to vector<8x96xf32>
    %351 = arith.addf %349, %350 : vector<8x96xf32>
    %352 = vector.extract_strided_slice %348 {offsets = [0, 0], sizes = [8, 32], strides = [1, 1]} : vector<8x96xf32> to vector<8x32xf32>
    %353 = vector.extract_strided_slice %351 {offsets = [0, 0], sizes = [8, 32], strides = [1, 1]} : vector<8x96xf32> to vector<8x32xf32>
    %354 = arith.addf %352, %353 : vector<8x32xf32>
    %355 = arith.negf %354 : vector<8x32xf32>
    %356 = math.exp %355 : vector<8x32xf32>
    %cst_65 = arith.constant 1.000000e+00 : f32
    %357 = vector.broadcast %cst_65 : f32 to vector<8x32xf32>
    %358 = arith.addf %357, %356 : vector<8x32xf32>
    %359 = arith.divf %357, %358 : vector<8x32xf32>
    %360 = vector.extract_strided_slice %348 {offsets = [0, 32], sizes = [8, 32], strides = [1, 1]} : vector<8x96xf32> to vector<8x32xf32>
    %361 = vector.extract_strided_slice %351 {offsets = [0, 32], sizes = [8, 32], strides = [1, 1]} : vector<8x96xf32> to vector<8x32xf32>
    %362 = arith.addf %360, %361 : vector<8x32xf32>
    %363 = arith.negf %362 : vector<8x32xf32>
    %364 = math.exp %363 : vector<8x32xf32>
    %cst_66 = arith.constant 1.000000e+00 : f32
    %365 = vector.broadcast %cst_66 : f32 to vector<8x32xf32>
    %366 = arith.addf %365, %364 : vector<8x32xf32>
    %367 = arith.divf %365, %366 : vector<8x32xf32>
    %368 = vector.extract_strided_slice %348 {offsets = [0, 64], sizes = [8, 32], strides = [1, 1]} : vector<8x96xf32> to vector<8x32xf32>
    %369 = vector.extract_strided_slice %351 {offsets = [0, 64], sizes = [8, 32], strides = [1, 1]} : vector<8x96xf32> to vector<8x32xf32>
    %370 = arith.mulf %359, %369 : vector<8x32xf32>
    %371 = arith.addf %368, %370 : vector<8x32xf32>
    %372 = math.tanh %371 : vector<8x32xf32>
    %cst_67 = arith.constant 1.000000e+00 : f32
    %373 = vector.broadcast %cst_67 : f32 to vector<8x32xf32>
    %374 = arith.subf %373, %367 : vector<8x32xf32>
    %375 = arith.mulf %374, %372 : vector<8x32xf32>
    %376 = arith.mulf %367, %347 : vector<8x32xf32>
    %377 = arith.addf %375, %376 : vector<8x32xf32>
    %378 = vector.extract_strided_slice %254 {offsets = [32, 0], sizes = [8, 96], strides = [1, 1]} : vector<64x96xf32> to vector<8x96xf32>
    %cst_68 = arith.constant dense<0.000000e+00> : vector<8x96xf32>
    %379 = tpu.matmul %377, %255, %cst_68 {dimension_numbers = #tpu.dot_dimension_numbers<[1], [0], [0], [1], [0, 0, 1, 1], [], []>} : vector<8x32xf32>, vector<32x96xf32>, vector<8x96xf32> -> vector<8x96xf32>
    %380 = vector.broadcast %256 : vector<1x96xf32> to vector<8x96xf32>
    %381 = arith.addf %379, %380 : vector<8x96xf32>
    %382 = vector.extract_strided_slice %378 {offsets = [0, 0], sizes = [8, 32], strides = [1, 1]} : vector<8x96xf32> to vector<8x32xf32>
    %383 = vector.extract_strided_slice %381 {offsets = [0, 0], sizes = [8, 32], strides = [1, 1]} : vector<8x96xf32> to vector<8x32xf32>
    %384 = arith.addf %382, %383 : vector<8x32xf32>
    %385 = arith.negf %384 : vector<8x32xf32>
    %386 = math.exp %385 : vector<8x32xf32>
    %cst_69 = arith.constant 1.000000e+00 : f32
    %387 = vector.broadcast %cst_69 : f32 to vector<8x32xf32>
    %388 = arith.addf %387, %386 : vector<8x32xf32>
    %389 = arith.divf %387, %388 : vector<8x32xf32>
    %390 = vector.extract_strided_slice %378 {offsets = [0, 32], sizes = [8, 32], strides = [1, 1]} : vector<8x96xf32> to vector<8x32xf32>
    %391 = vector.extract_strided_slice %381 {offsets = [0, 32], sizes = [8, 32], strides = [1, 1]} : vector<8x96xf32> to vector<8x32xf32>
    %392 = arith.addf %390, %391 : vector<8x32xf32>
    %393 = arith.negf %392 : vector<8x32xf32>
    %394 = math.exp %393 : vector<8x32xf32>
    %cst_70 = arith.constant 1.000000e+00 : f32
    %395 = vector.broadcast %cst_70 : f32 to vector<8x32xf32>
    %396 = arith.addf %395, %394 : vector<8x32xf32>
    %397 = arith.divf %395, %396 : vector<8x32xf32>
    %398 = vector.extract_strided_slice %378 {offsets = [0, 64], sizes = [8, 32], strides = [1, 1]} : vector<8x96xf32> to vector<8x32xf32>
    %399 = vector.extract_strided_slice %381 {offsets = [0, 64], sizes = [8, 32], strides = [1, 1]} : vector<8x96xf32> to vector<8x32xf32>
    %400 = arith.mulf %389, %399 : vector<8x32xf32>
    %401 = arith.addf %398, %400 : vector<8x32xf32>
    %402 = math.tanh %401 : vector<8x32xf32>
    %cst_71 = arith.constant 1.000000e+00 : f32
    %403 = vector.broadcast %cst_71 : f32 to vector<8x32xf32>
    %404 = arith.subf %403, %397 : vector<8x32xf32>
    %405 = arith.mulf %404, %402 : vector<8x32xf32>
    %406 = arith.mulf %397, %377 : vector<8x32xf32>
    %407 = arith.addf %405, %406 : vector<8x32xf32>
    %408 = vector.extract_strided_slice %254 {offsets = [40, 0], sizes = [8, 96], strides = [1, 1]} : vector<64x96xf32> to vector<8x96xf32>
    %cst_72 = arith.constant dense<0.000000e+00> : vector<8x96xf32>
    %409 = tpu.matmul %407, %255, %cst_72 {dimension_numbers = #tpu.dot_dimension_numbers<[1], [0], [0], [1], [0, 0, 1, 1], [], []>} : vector<8x32xf32>, vector<32x96xf32>, vector<8x96xf32> -> vector<8x96xf32>
    %410 = vector.broadcast %256 : vector<1x96xf32> to vector<8x96xf32>
    %411 = arith.addf %409, %410 : vector<8x96xf32>
    %412 = vector.extract_strided_slice %408 {offsets = [0, 0], sizes = [8, 32], strides = [1, 1]} : vector<8x96xf32> to vector<8x32xf32>
    %413 = vector.extract_strided_slice %411 {offsets = [0, 0], sizes = [8, 32], strides = [1, 1]} : vector<8x96xf32> to vector<8x32xf32>
    %414 = arith.addf %412, %413 : vector<8x32xf32>
    %415 = arith.negf %414 : vector<8x32xf32>
    %416 = math.exp %415 : vector<8x32xf32>
    %cst_73 = arith.constant 1.000000e+00 : f32
    %417 = vector.broadcast %cst_73 : f32 to vector<8x32xf32>
    %418 = arith.addf %417, %416 : vector<8x32xf32>
    %419 = arith.divf %417, %418 : vector<8x32xf32>
    %420 = vector.extract_strided_slice %408 {offsets = [0, 32], sizes = [8, 32], strides = [1, 1]} : vector<8x96xf32> to vector<8x32xf32>
    %421 = vector.extract_strided_slice %411 {offsets = [0, 32], sizes = [8, 32], strides = [1, 1]} : vector<8x96xf32> to vector<8x32xf32>
    %422 = arith.addf %420, %421 : vector<8x32xf32>
    %423 = arith.negf %422 : vector<8x32xf32>
    %424 = math.exp %423 : vector<8x32xf32>
    %cst_74 = arith.constant 1.000000e+00 : f32
    %425 = vector.broadcast %cst_74 : f32 to vector<8x32xf32>
    %426 = arith.addf %425, %424 : vector<8x32xf32>
    %427 = arith.divf %425, %426 : vector<8x32xf32>
    %428 = vector.extract_strided_slice %408 {offsets = [0, 64], sizes = [8, 32], strides = [1, 1]} : vector<8x96xf32> to vector<8x32xf32>
    %429 = vector.extract_strided_slice %411 {offsets = [0, 64], sizes = [8, 32], strides = [1, 1]} : vector<8x96xf32> to vector<8x32xf32>
    %430 = arith.mulf %419, %429 : vector<8x32xf32>
    %431 = arith.addf %428, %430 : vector<8x32xf32>
    %432 = math.tanh %431 : vector<8x32xf32>
    %cst_75 = arith.constant 1.000000e+00 : f32
    %433 = vector.broadcast %cst_75 : f32 to vector<8x32xf32>
    %434 = arith.subf %433, %427 : vector<8x32xf32>
    %435 = arith.mulf %434, %432 : vector<8x32xf32>
    %436 = arith.mulf %427, %407 : vector<8x32xf32>
    %437 = arith.addf %435, %436 : vector<8x32xf32>
    %438 = vector.extract_strided_slice %254 {offsets = [48, 0], sizes = [8, 96], strides = [1, 1]} : vector<64x96xf32> to vector<8x96xf32>
    %cst_76 = arith.constant dense<0.000000e+00> : vector<8x96xf32>
    %439 = tpu.matmul %437, %255, %cst_76 {dimension_numbers = #tpu.dot_dimension_numbers<[1], [0], [0], [1], [0, 0, 1, 1], [], []>} : vector<8x32xf32>, vector<32x96xf32>, vector<8x96xf32> -> vector<8x96xf32>
    %440 = vector.broadcast %256 : vector<1x96xf32> to vector<8x96xf32>
    %441 = arith.addf %439, %440 : vector<8x96xf32>
    %442 = vector.extract_strided_slice %438 {offsets = [0, 0], sizes = [8, 32], strides = [1, 1]} : vector<8x96xf32> to vector<8x32xf32>
    %443 = vector.extract_strided_slice %441 {offsets = [0, 0], sizes = [8, 32], strides = [1, 1]} : vector<8x96xf32> to vector<8x32xf32>
    %444 = arith.addf %442, %443 : vector<8x32xf32>
    %445 = arith.negf %444 : vector<8x32xf32>
    %446 = math.exp %445 : vector<8x32xf32>
    %cst_77 = arith.constant 1.000000e+00 : f32
    %447 = vector.broadcast %cst_77 : f32 to vector<8x32xf32>
    %448 = arith.addf %447, %446 : vector<8x32xf32>
    %449 = arith.divf %447, %448 : vector<8x32xf32>
    %450 = vector.extract_strided_slice %438 {offsets = [0, 32], sizes = [8, 32], strides = [1, 1]} : vector<8x96xf32> to vector<8x32xf32>
    %451 = vector.extract_strided_slice %441 {offsets = [0, 32], sizes = [8, 32], strides = [1, 1]} : vector<8x96xf32> to vector<8x32xf32>
    %452 = arith.addf %450, %451 : vector<8x32xf32>
    %453 = arith.negf %452 : vector<8x32xf32>
    %454 = math.exp %453 : vector<8x32xf32>
    %cst_78 = arith.constant 1.000000e+00 : f32
    %455 = vector.broadcast %cst_78 : f32 to vector<8x32xf32>
    %456 = arith.addf %455, %454 : vector<8x32xf32>
    %457 = arith.divf %455, %456 : vector<8x32xf32>
    %458 = vector.extract_strided_slice %438 {offsets = [0, 64], sizes = [8, 32], strides = [1, 1]} : vector<8x96xf32> to vector<8x32xf32>
    %459 = vector.extract_strided_slice %441 {offsets = [0, 64], sizes = [8, 32], strides = [1, 1]} : vector<8x96xf32> to vector<8x32xf32>
    %460 = arith.mulf %449, %459 : vector<8x32xf32>
    %461 = arith.addf %458, %460 : vector<8x32xf32>
    %462 = math.tanh %461 : vector<8x32xf32>
    %cst_79 = arith.constant 1.000000e+00 : f32
    %463 = vector.broadcast %cst_79 : f32 to vector<8x32xf32>
    %464 = arith.subf %463, %457 : vector<8x32xf32>
    %465 = arith.mulf %464, %462 : vector<8x32xf32>
    %466 = arith.mulf %457, %437 : vector<8x32xf32>
    %467 = arith.addf %465, %466 : vector<8x32xf32>
    %468 = vector.extract_strided_slice %254 {offsets = [56, 0], sizes = [8, 96], strides = [1, 1]} : vector<64x96xf32> to vector<8x96xf32>
    %cst_80 = arith.constant dense<0.000000e+00> : vector<8x96xf32>
    %469 = tpu.matmul %467, %255, %cst_80 {dimension_numbers = #tpu.dot_dimension_numbers<[1], [0], [0], [1], [0, 0, 1, 1], [], []>} : vector<8x32xf32>, vector<32x96xf32>, vector<8x96xf32> -> vector<8x96xf32>
    %470 = vector.broadcast %256 : vector<1x96xf32> to vector<8x96xf32>
    %471 = arith.addf %469, %470 : vector<8x96xf32>
    %472 = vector.extract_strided_slice %468 {offsets = [0, 0], sizes = [8, 32], strides = [1, 1]} : vector<8x96xf32> to vector<8x32xf32>
    %473 = vector.extract_strided_slice %471 {offsets = [0, 0], sizes = [8, 32], strides = [1, 1]} : vector<8x96xf32> to vector<8x32xf32>
    %474 = arith.addf %472, %473 : vector<8x32xf32>
    %475 = arith.negf %474 : vector<8x32xf32>
    %476 = math.exp %475 : vector<8x32xf32>
    %cst_81 = arith.constant 1.000000e+00 : f32
    %477 = vector.broadcast %cst_81 : f32 to vector<8x32xf32>
    %478 = arith.addf %477, %476 : vector<8x32xf32>
    %479 = arith.divf %477, %478 : vector<8x32xf32>
    %480 = vector.extract_strided_slice %468 {offsets = [0, 32], sizes = [8, 32], strides = [1, 1]} : vector<8x96xf32> to vector<8x32xf32>
    %481 = vector.extract_strided_slice %471 {offsets = [0, 32], sizes = [8, 32], strides = [1, 1]} : vector<8x96xf32> to vector<8x32xf32>
    %482 = arith.addf %480, %481 : vector<8x32xf32>
    %483 = arith.negf %482 : vector<8x32xf32>
    %484 = math.exp %483 : vector<8x32xf32>
    %cst_82 = arith.constant 1.000000e+00 : f32
    %485 = vector.broadcast %cst_82 : f32 to vector<8x32xf32>
    %486 = arith.addf %485, %484 : vector<8x32xf32>
    %487 = arith.divf %485, %486 : vector<8x32xf32>
    %488 = vector.extract_strided_slice %468 {offsets = [0, 64], sizes = [8, 32], strides = [1, 1]} : vector<8x96xf32> to vector<8x32xf32>
    %489 = vector.extract_strided_slice %471 {offsets = [0, 64], sizes = [8, 32], strides = [1, 1]} : vector<8x96xf32> to vector<8x32xf32>
    %490 = arith.mulf %479, %489 : vector<8x32xf32>
    %491 = arith.addf %488, %490 : vector<8x32xf32>
    %492 = math.tanh %491 : vector<8x32xf32>
    %cst_83 = arith.constant 1.000000e+00 : f32
    %493 = vector.broadcast %cst_83 : f32 to vector<8x32xf32>
    %494 = arith.subf %493, %487 : vector<8x32xf32>
    %495 = arith.mulf %494, %492 : vector<8x32xf32>
    %496 = arith.mulf %487, %467 : vector<8x32xf32>
    %497 = arith.addf %495, %496 : vector<8x32xf32>
    %cst_84 = arith.constant dense<0.000000e+00> : vector<8xf32>
    %498 = vector.multi_reduction <add>, %497, %cst_84 [1] : vector<8x32xf32> to vector<8xf32>
    %499 = vector.shape_cast %498 : vector<8xf32> to vector<8x1xf32>
    %cst_85 = arith.constant 3.200000e+01 : f32
    %500 = vector.broadcast %cst_85 : f32 to vector<8x1xf32>
    %501 = arith.divf %499, %500 : vector<8x1xf32>
    %502 = vector.broadcast %501 : vector<8x1xf32> to vector<8x32xf32>
    %503 = arith.subf %497, %502 : vector<8x32xf32>
    %504 = arith.mulf %503, %503 : vector<8x32xf32>
    %cst_86 = arith.constant dense<0.000000e+00> : vector<8xf32>
    %505 = vector.multi_reduction <add>, %504, %cst_86 [1] : vector<8x32xf32> to vector<8xf32>
    %506 = vector.shape_cast %505 : vector<8xf32> to vector<8x1xf32>
    %cst_87 = arith.constant 3.200000e+01 : f32
    %507 = vector.broadcast %cst_87 : f32 to vector<8x1xf32>
    %508 = arith.divf %506, %507 : vector<8x1xf32>
    %509 = vector.broadcast %501 : vector<8x1xf32> to vector<8x32xf32>
    %510 = arith.subf %497, %509 : vector<8x32xf32>
    %cst_88 = arith.constant 9.99999974E-6 : f32
    %511 = vector.broadcast %cst_88 : f32 to vector<8x1xf32>
    %512 = arith.addf %508, %511 : vector<8x1xf32>
    %513 = math.rsqrt %512 : vector<8x1xf32>
    %514 = vector.broadcast %513 : vector<8x1xf32> to vector<8x32xf32>
    %515 = arith.mulf %510, %514 : vector<8x32xf32>
    %c0_89 = arith.constant 0 : index
    %c0_90 = arith.constant 0 : index
    %516 = vector.load %arg9[%c0_89, %c0_90] : memref<1x32xf32, #tpu.memory_space<vmem>>, vector<1x32xf32>
    %517 = vector.broadcast %516 : vector<1x32xf32> to vector<8x32xf32>
    %518 = arith.mulf %515, %517 : vector<8x32xf32>
    %c0_91 = arith.constant 0 : index
    %c0_92 = arith.constant 0 : index
    %519 = vector.load %arg10[%c0_91, %c0_92] : memref<1x32xf32, #tpu.memory_space<vmem>>, vector<1x32xf32>
    %520 = vector.broadcast %519 : vector<1x32xf32> to vector<8x32xf32>
    %521 = arith.addf %518, %520 : vector<8x32xf32>
    %c0_93 = arith.constant 0 : index
    %c0_94 = arith.constant 0 : index
    %522 = vector.load %arg11[%c0_93, %c0_94] : memref<32x5xf32, #tpu.memory_space<vmem>>, vector<32x5xf32>
    %cst_95 = arith.constant dense<0.000000e+00> : vector<8x5xf32>
    %523 = tpu.matmul %521, %522, %cst_95 {dimension_numbers = #tpu.dot_dimension_numbers<[1], [0], [0], [1], [0, 0, 1, 1], [], []>} : vector<8x32xf32>, vector<32x5xf32>, vector<8x5xf32> -> vector<8x5xf32>
    %c0_96 = arith.constant 0 : index
    %c0_97 = arith.constant 0 : index
    %524 = vector.load %arg12[%c0_96, %c0_97] : memref<1x5xf32, #tpu.memory_space<vmem>>, vector<1x5xf32>
    %525 = vector.broadcast %524 : vector<1x5xf32> to vector<8x5xf32>
    %526 = arith.addf %523, %525 : vector<8x5xf32>
    %c0_98 = arith.constant 0 : index
    %c0_99 = arith.constant 0 : index
    %527 = vector.load %arg13[%c0_98, %c0_99] : memref<8x5xf32, #tpu.memory_space<vmem>>, vector<8x5xf32>
    tpu.vector_store %arg13[%c0_98, %c0_99], %526 {strides = array<i32>} : memref<8x5xf32, #tpu.memory_space<vmem>>, vector<8x5xf32>,
    return
  }
}

</mosaic_0001>

<bundles_post_ra>
// kernel: forward.1
= control target key start
LH: loop header
LB: loop body
LE: loop exit
PB: predicated region body
PF: predicated region fallthrough
CT: control target
= control target key end

     0   :  { %vm85_vm0 = vcmask 1043456   ;;  %vm60_vm1 = vcmask 31744   ;;  %v2677_v0 = vmov 0.0|0.0   ;;  %vm2678_vm2 = vmmov 0   ;;  %s2680_s22 = smov 64   ;;  %s3156_s2 = inlined_call_operand.vmem [shape: f32[32,96], index: 2, kind: input, shape index: {}]   ;;  %s3157_s1 = inlined_call_operand.vmem [shape: f32[4,96], index: 1, kind: input, shape index: {}]   ;;  %s3158_s0 = inlined_call_operand.vmem [shape: f32[64,4], index: 0, kind: input, shape index: {}]   ;;  %s3159_s4 = inlined_call_operand.vmem [shape: f32[1,96], index: 4, kind: input, shape index: {}]   ;;  %s3160_s3 = inlined_call_operand.vmem [shape: f32[1,96], index: 3, kind: input, shape index: {}]   ;;  %s3161_s5 = inlined_call_operand.vmem [shape: f32[32,96], index: 5, kind: input, shape index: {}]   ;;  %s3162_s6 = inlined_call_operand.vmem [shape: f32[32,96], index: 6, kind: input, shape index: {}]   ;;  %s3163_s8 = inlined_call_operand.vmem [shape: f32[1,96], index: 8, kind: input, shape index: {}]   ;;  %s3164_s7 = inlined_call_operand.vmem [shape: f32[1,96], index: 7, kind: input, shape index: {}]   ;;  %s3165_s9 = inlined_call_operand.vmem [shape: f32[1,32], index: 9, kind: input, shape index: {}]   ;;  %s3166_s10 = inlined_call_operand.vmem [shape: f32[1,32], index: 10, kind: input, shape index: {}]   ;;  %s3167_s11 = inlined_call_operand.vmem [shape: f32[32,5], index: 11, kind: input, shape index: {}]   ;;  %s3168_s12 = inlined_call_operand.vmem [shape: f32[1,5], index: 12, kind: input, shape index: {}]   ;;  %s3169_s13 = inlined_call_operand.vmem [shape: f32[8,5], index: 13, kind: output, shape index: {}]  }
   0x1   :  { %2463 = vmatprep.subr.bf16.mxu1 %v2677_v0  ;;  %v194_v1 = vld [vmem:[%s3156_s2] sm:$0xff]  ;;  %v195_v2 = vld [vmem:[%s3156_s2 + $0x8] sm:$0xff]  ;;  %v196_v5 = vld [vmem:[%s3156_s2 + $0x10] sm:$0xff]  ;;  %v2679_v8 = vmov 0.0   ;;  %vm205_vm3 = vcmask 261120   ;;  %vm2075_vm4 = vcmask 39936  }
   0x2   :  { %v52_v3 = vld [vmem:[%s3157_s1] sm:$0xf]  ;;  %v2763_v4 = vpack.c.bf16 %v195_v2, %v194_v1  ;;  %v197_v6 = vld [vmem:[%s3156_s2 + $0x18] sm:$0xff]  ;;  %2264 = vmatprep.mubr.msk.f32.mxu1 %vm2678_vm2, %v2679_v8  ;;  %v45_v9 = vld [vmem:[%s3158_s0 + $0x8] sm:$0xff] }
   0x3   :  { %2242 = vmatprep.subr.msk.mxu0 %vm85_vm0, %v52_v3  ;;  %v44_v7 = vld [vmem:[%s3158_s0] sm:$0xff]  ;;  %v2783_v10 = vpack.c.bf16 %v197_v6, %v196_v5  ;;  %v46_v48 = vld [vmem:[%s3158_s0 + $0x10] sm:$0xff]  ;;  %v47_v49 = vld [vmem:[%s3158_s0 + $0x18] sm:$0xff] }
   0x4   :  { %2243 = vmatpush3.msk.msra.mxu0 %vm85_vm0, %v52_v3  ;;  %2244 = vmatprep.mubr.msk.f32.mxu0 %vm60_vm1, %v44_v7  ;;  %v2804_v13 = vld [vmem:[%s3159_s4] ss:$0 sm:$0xff]  ;;  %s2681_s4 = smov 96   ;;  %v49_v51 = vld [vmem:[%s3158_s0 + $0x28] sm:$0xff]  ;;  %v50_v52 = vld [vmem:[%s3158_s0 + $0x30] sm:$0xff] }
   0x5   :  { %2465 = vmatpush3.bf16.msra.mxu1 %v2763_v4  ;;  %2245 = vmatmul.mubr.msk.f32.vlgmr.msra.gmra.mrb[0].mxu0 %vm60_vm1, %v45_v9  ;;  %v2811_v17 = vld [vmem:[%s3160_s3] ss:$0 sm:$0xff]  ;;  %v51_v53 = vld [vmem:[%s3158_s0 + $0x38] sm:$0xff] }
   0x6   :  { %2466 = vmatprep.subr.bf16.mxu1 %v2677_v0  ;;  %2475 = vmatprep.subr.bf16.mxu0 %v2677_v0  ;;  %v48_v50 = vld [vmem:[%s3158_s0 + $0x20] sm:$0xff] }
   0x7   :  { %2477 = vmatpush3.bf16.msra.mxu0 %v2763_v4  ;;  %2247 = vmatprep.mubr.msk.f32.mxu0 %vm60_vm1, %v46_v48 }
   0x8   :  { %2478 = vmatprep.subr.bf16.mxu0 %v2677_v0 }
   0x9   :  { %2468 = vmatpush3.bf16.msra.mxu1 %v2783_v10  ;;  %2248 = vmatmul.mubr.msk.f32.gmra.mrb[2].mxu0 %vm60_vm1, %v47_v49 }
   0xa   :  { %2469 = vmatprep.subr.bf16.mxu1 %v2677_v0  ;;  %2250 = vmatprep.mubr.msk.f32.mxu0 %vm60_vm1, %v48_v50 }
   0xb   :  { %2480 = vmatpush3.bf16.msra.mxu0 %v2783_v10 }
   0xc   :  { %2265 = vmatmul.mubr.f32.vlgmr.msra.gmra.mrb[0].mxu1 %v2679_v8  ;;  %2487 = vmatprep.subr.bf16.mxu0 %v2677_v0 }
   0xd   :  { %2471 = vmatpush3.bf16.msra.mxu1 %v2763_v4  ;;  %2275 = vmatprep.mubr.msk.f32.mxu1 %vm2678_vm2, %v2679_v8 }
   0xe   :  { %2472 = vmatprep.subr.bf16.mxu1 %v2677_v0  ;;  %2251 = vmatmul.mubr.msk.f32.gmra.mrb[4].mxu0 %vm60_vm1, %v49_v51 }
   0xf   :  { %2253 = vmatprep.mubr.msk.f32.mxu0 %vm60_vm1, %v50_v52 }
  0x11   :  { %2474 = vmatpush3.bf16.msra.mxu1 %v2783_v10 }
  0x12   :  { %2481 = vmatprep.subr.bf16.mxu1 %v2677_v0  ;;  %2254 = vmatmul.mubr.msk.f32.gmra.mrb[6].mxu0 %vm60_vm1, %v51_v53 }
  0x13   :  { %2286 = vmatprep.mubr.msk.f32.mxu0 %vm2678_vm2, %v2679_v8 }
  0xd8   :  { %v2246_v11 = vpop.f32.mrb[0].mxu0 }
  0xd9   :  { %v155_v12 = vpop.f32.mrb[1].mxu0  ;;  %v161_v38 = vadd.f32 %v2246_v11, %v2811_v17 }
  0xda   :  { %v156_v18 = vadd.f32 %v2811_v17, %v155_v12 }
  0xdc   :  { %v2249_v60 = vpop.f32.mrb[2].mxu0 }
  0xdd   :  { %v165_v61 = vpop.f32.mrb[3].mxu0 }
  0xde   :  { %v166_v9 = vadd.f32 %v2811_v17, %v165_v61 }
  0xdf   :  { %v275_v14 = vpop.f32.mrb[0].mxu1 }
  0xe0   :  { %v276_v15 = vadd.f32 %v2804_v13, %v275_v14  ;;  %v2266_v16 = vpop.f32.mrb[1].mxu1 }
  0xe1   :  { %v2859_v62 = vpop.f32.mrb[4].mxu0 }
  0xe2   :  { %287 = vrot.lane.b32.xlu0 %v276_v15, %s2680_s22  ;;  %v279_v19 = vadd.f32 %v276_v15, %v156_v18  ;;  %v2861_v63 = vpop.f32.mrb[5].mxu0 }
  0xe3   :  { %v176_v53 = vadd.f32 %v2811_v17, %v2861_v63 }
  0xe4   :  { %v2092_v20 = vmul.f32 -1.442695, %v279_v19 }
  0xe5   :  { %v2863_v1 = vpop.f32.mrb[6].mxu0 }
  0xe6   :  { %2579 = vpow2.f32 %v2092_v20  ;;  %v2865_v2 = vpop.f32.mrb[7].mxu0 }
  0xf0   :  { %v2580_v21 = vpop.eup %2579 }
  0xf1   :  { %v283_v22 = vadd.f32 1.0, %v2580_v21 }
  0xf3   :  { %2581 = vrcp.f32 %v283_v22 }
  0xfd   :  { %v2582_v23 = vpop.eup %2581 }
  0xfe   :  { %v297_v29 = vsub.f32 1.0, %v2582_v23  ;;  %v303_v31 = vmul.f32 0.0, %v2582_v23 }
 0x154   :  { %v288_v24 = vpop.permute.xlu0 %287 }
 0x155   :  { %v290_v25 = vmul.f32 %v2582_v23, %v288_v24 }
 0x157   :  { %292 = vrot.lane.b32.xlu0 %v290_v25, %s2680_s22 }
 0x1c9   :  { %v293_v26 = vpop.permute.xlu0 %292 }
 0x1ca   :  { %v295_v27 = vadd.f32 %v293_v26, %v156_v18 }
 0x1cc   :  { %2583 = vtanh.f32 %v295_v27 }
 0x1d6   :  { %v2584_v28 = vpop.eup %2583 }
 0x1d7   :  { %299 = vrot.lane.b32.xlu1 %v2584_v28, %s2681_s4 }
 0x249   :  { %v300_v30 = vpop.permute.xlu1 %299 }
 0x24a   :  { %v302_v32 = vmul.f32 %v300_v30, %v297_v29 }
 0x24c   :  { %v304_v33 = vadd.f32 %v303_v31, %v302_v32  ;;  %v171_v32 = vadd.f32 %v2249_v60, %v2811_v17 }
 0x24e   :  { %306 = vrot.lane.b32.xlu1 %v304_v33, %s2681_s4 }
 0x2c0   :  { %v2817_v34 = vpop.permute.xlu1 %306 }
 0x2c1   :  { %2276 = vmatmul.mubr.msk.f32.vlgmr.msra.gmra.mrb[2].mxu1 %vm205_vm3, %v2817_v34 }
 0x2c2   :  { %2483 = vmatpush3.bf16.msra.mxu1 %v2763_v4  ;;  %2297 = vmatprep.mubr.msk.f32.mxu1 %vm2678_vm2, %v2679_v8 }
 0x2c3   :  { %2484 = vmatprep.subr.bf16.mxu1 %v2677_v0 }
 0x2c6   :  { %2486 = vmatpush3.bf16.msra.mxu1 %v2783_v10 }
 0x2c7   :  { %2493 = vmatprep.subr.bf16.mxu1 %v2677_v0 }
 0x394   :  { %v376_v35 = vpop.f32.mrb[2].mxu1 }
 0x395   :  { %v377_v36 = vadd.f32 %v2804_v13, %v376_v35  ;;  %v2277_v37 = vpop.f32.mrb[3].mxu1 }
 0x397   :  { %388 = vrot.lane.b32.xlu0 %v377_v36, %s2680_s22  ;;  %v380_v39 = vadd.f32 %v377_v36, %v161_v38 }
 0x399   :  { %v2094_v40 = vmul.f32 -1.442695, %v380_v39 }
 0x39b   :  { %2585 = vpow2.f32 %v2094_v40 }
 0x3a5   :  { %v2586_v41 = vpop.eup %2585 }
 0x3a6   :  { %v384_v42 = vadd.f32 1.0, %v2586_v41 }
 0x3a8   :  { %2587 = vrcp.f32 %v384_v42 }
 0x3b2   :  { %v2588_v43 = vpop.eup %2587 }
 0x3b3   :  { %v398_v55 = vsub.f32 1.0, %v2588_v43  ;;  %v404_v57 = vmul.f32 %v2588_v43, %v304_v33 }
 0x409   :  { %v389_v44 = vpop.permute.xlu0 %388 }
 0x40a   :  { %v391_v45 = vmul.f32 %v2588_v43, %v389_v44 }
 0x40c   :  { %393 = vrot.lane.b32.xlu1 %v391_v45, %s2680_s22 }
 0x47e   :  { %v394_v46 = vpop.permute.xlu1 %393 }
 0x47f   :  { %v396_v47 = vadd.f32 %v394_v46, %v161_v38 }
 0x481   :  { %2589 = vtanh.f32 %v396_v47 }
 0x48b   :  { %v2590_v54 = vpop.eup %2589 }
 0x48c   :  { %400 = vrot.lane.b32.xlu0 %v2590_v54, %s2681_s4 }
 0x4fe   :  { %v401_v56 = vpop.permute.xlu0 %400 }
 0x4ff   :  { %v403_v58 = vmul.f32 %v401_v56, %v398_v55 }
 0x501   :  { %v405_v59 = vadd.f32 %v404_v57, %v403_v58 }
 0x503   :  { %407 = vrot.lane.b32.xlu1 %v405_v59, %s2681_s4 }
 0x575   :  { %v2867_v3 = vpop.permute.xlu1 %407 }
 0x576   :  { %2287 = vmatmul.mubr.msk.f32.vlgmr.msra.gmra.mrb[8].mxu0 %vm205_vm3, %v2867_v3 }
 0x577   :  { %2489 = vmatpush3.bf16.msra.mxu0 %v2763_v4  ;;  %2308 = vmatprep.mubr.msk.f32.mxu0 %vm2678_vm2, %v2679_v8 }
 0x578   :  { %2490 = vmatprep.subr.bf16.mxu0 %v2677_v0 }
 0x57b   :  { %2492 = vmatpush3.bf16.msra.mxu0 %v2783_v10 }
 0x57c   :  { %2499 = vmatprep.subr.bf16.mxu0 %v2677_v0 }
 0x649   :  { %v477_v5 = vpop.f32.mrb[8].mxu0 }
 0x64a   :  { %v478_v6 = vadd.f32 %v2804_v13, %v477_v5  ;;  %v2288_v7 = vpop.f32.mrb[9].mxu0 }
 0x64c   :  { %489 = vrot.lane.b32.xlu0 %v478_v6, %s2680_s22  ;;  %v481_v11 = vadd.f32 %v478_v6, %v166_v9 }
 0x64e   :  { %v2096_v12 = vmul.f32 -1.442695, %v481_v11 }
 0x650   :  { %2591 = vpow2.f32 %v2096_v12 }
 0x65a   :  { %v2592_v14 = vpop.eup %2591 }
 0x65b   :  { %v485_v15 = vadd.f32 1.0, %v2592_v14 }
 0x65d   :  { %2593 = vrcp.f32 %v485_v15 }
 0x667   :  { %v2594_v16 = vpop.eup %2593 }
 0x668   :  { %v499_v23 = vsub.f32 1.0, %v2594_v16  ;;  %v505_v25 = vmul.f32 %v2594_v16, %v405_v59 }
 0x6be   :  { %v490_v18 = vpop.permute.xlu0 %489 }
 0x6bf   :  { %v492_v19 = vmul.f32 %v2594_v16, %v490_v18 }
 0x6c1   :  { %494 = vrot.lane.b32.xlu1 %v492_v19, %s2680_s22  ;;  %v181_v19 = vadd.f32 %v2859_v62, %v2811_v17  ;;  %v1013_v62 = vld [vmem:[%s3161_s5 + $0x8] sm:$0xff] }
 0x733   :  { %v495_v20 = vpop.permute.xlu1 %494 }
 0x734   :  { %v497_v21 = vadd.f32 %v495_v20, %v166_v9 }
 0x736   :  { %2595 = vtanh.f32 %v497_v21 }
 0x740   :  { %v2596_v22 = vpop.eup %2595 }
 0x741   :  { %501 = vrot.lane.b32.xlu0 %v2596_v22, %s2681_s4 }
 0x7b3   :  { %v502_v24 = vpop.permute.xlu0 %501 }
 0x7b4   :  { %v504_v26 = vmul.f32 %v502_v24, %v499_v23 }
 0x7b6   :  { %v506_v27 = vadd.f32 %v505_v25, %v504_v26 }
 0x7b8   :  { %508 = vrot.lane.b32.xlu1 %v506_v27, %s2681_s4 }
 0x82a   :  { %v2883_v28 = vpop.permute.xlu1 %508 }
 0x82b   :  { %2298 = vmatmul.mubr.msk.f32.vlgmr.msra.gmra.mrb[4].mxu1 %vm205_vm3, %v2883_v28 }
 0x82c   :  { %2495 = vmatpush3.bf16.msra.mxu1 %v2763_v4  ;;  %2319 = vmatprep.mubr.msk.f32.mxu1 %vm2678_vm2, %v2679_v8 }
 0x82d   :  { %2496 = vmatprep.subr.bf16.mxu1 %v2677_v0 }
 0x830   :  { %2498 = vmatpush3.bf16.msra.mxu1 %v2783_v10 }
 0x831   :  { %2505 = vmatprep.subr.bf16.mxu1 %v2677_v0 }
 0x8fe   :  { %v578_v29 = vpop.f32.mrb[4].mxu1 }
 0x8ff   :  { %v579_v30 = vadd.f32 %v2804_v13, %v578_v29  ;;  %v2299_v31 = vpop.f32.mrb[5].mxu1 }
 0x901   :  { %590 = vrot.lane.b32.xlu0 %v579_v30, %s2680_s22  ;;  %v582_v33 = vadd.f32 %v579_v30, %v171_v32 }
 0x903   :  { %v2098_v35 = vmul.f32 -1.442695, %v582_v33 }
 0x905   :  { %2597 = vpow2.f32 %v2098_v35 }
 0x90f   :  { %v2598_v36 = vpop.eup %2597 }
 0x910   :  { %v586_v37 = vadd.f32 1.0, %v2598_v36 }
 0x912   :  { %2599 = vrcp.f32 %v586_v37  ;;  %v1014_v37 = vld [vmem:[%s3161_s5 + $0x10] sm:$0xff] }
 0x91c   :  { %v2600_v38 = vpop.eup %2599 }
 0x91d   :  { %v600_v44 = vsub.f32 1.0, %v2600_v38  ;;  %v606_v46 = vmul.f32 %v2600_v38, %v506_v27  ;;  %v1012_v27 = vld [vmem:[%s3161_s5] sm:$0xff] }
 0x91e   :  { %v2511_v29 = vpack.c.bf16 %v1013_v62, %v1012_v27 }
 0x973   :  { %v591_v39 = vpop.permute.xlu0 %590 }
 0x974   :  { %v593_v40 = vmul.f32 %v2600_v38, %v591_v39  ;;  %v1015_v38 = vld [vmem:[%s3161_s5 + $0x18] sm:$0xff] }
 0x975   :  { %v2515_v39 = vpack.c.bf16 %v1015_v38, %v1014_v37 }
 0x976   :  { %595 = vrot.lane.b32.xlu1 %v593_v40, %s2680_s22 }
 0x9e8   :  { %v596_v41 = vpop.permute.xlu1 %595 }
 0x9e9   :  { %v598_v42 = vadd.f32 %v596_v41, %v171_v32 }
 0x9eb   :  { %2601 = vtanh.f32 %v598_v42 }
 0x9f5   :  { %v2602_v43 = vpop.eup %2601 }
 0x9f6   :  { %602 = vrot.lane.b32.xlu0 %v2602_v43, %s2681_s4 }
 0xa68   :  { %v603_v45 = vpop.permute.xlu0 %602 }
 0xa69   :  { %v605_v47 = vmul.f32 %v603_v45, %v600_v44 }
 0xa6b   :  { %v607_v48 = vadd.f32 %v606_v46, %v605_v47  ;;  %v186_v47 = vadd.f32 %v2811_v17, %v2865_v2  ;;  %v1133_v2 = vld [vmem:[%s3162_s6] sm:$0xff] }
 0xa6d   :  { %609 = vrot.lane.b32.xlu1 %v607_v48, %s2681_s4 }
 0xadf   :  { %v2899_v49 = vpop.permute.xlu1 %609 }
 0xae0   :  { %2309 = vmatmul.mubr.msk.f32.vlgmr.msra.gmra.mrb[10].mxu0 %vm205_vm3, %v2899_v49 }
 0xae1   :  { %2501 = vmatpush3.bf16.msra.mxu0 %v2763_v4  ;;  %2330 = vmatprep.mubr.msk.f32.mxu0 %vm2678_vm2, %v2679_v8 }
 0xae2   :  { %2502 = vmatprep.subr.bf16.mxu0 %v2677_v0 }
 0xae5   :  { %2504 = vmatpush3.bf16.msra.mxu0 %v2783_v10 }
 0xae6   :  { %2512 = vmatprep.subr.bf16.mxu0 %v2511_v29 }
 0xbb3   :  { %v679_v50 = vpop.f32.mrb[10].mxu0 }
 0xbb4   :  { %v680_v51 = vadd.f32 %v2804_v13, %v679_v50  ;;  %v2310_v52 = vpop.f32.mrb[11].mxu0 }
 0xbb6   :  { %691 = vrot.lane.b32.xlu0 %v680_v51, %s2680_s22  ;;  %v683_v54 = vadd.f32 %v680_v51, %v176_v53 }
 0xbb8   :  { %v2100_v55 = vmul.f32 -1.442695, %v683_v54 }
 0xbba   :  { %2603 = vpow2.f32 %v2100_v55 }
 0xbc4   :  { %v2604_v56 = vpop.eup %2603 }
 0xbc5   :  { %v687_v57 = vadd.f32 1.0, %v2604_v56 }
 0xbc7   :  { %2605 = vrcp.f32 %v687_v57 }
 0xbd1   :  { %v2606_v58 = vpop.eup %2605 }
 0xbd2   :  { %v701_v7 = vsub.f32 1.0, %v2606_v58  ;;  %v707_v63 = vmul.f32 %v2606_v58, %v607_v48 }
 0xc28   :  { %v692_v59 = vpop.permute.xlu0 %691 }
 0xc29   :  { %v694_v60 = vmul.f32 %v2606_v58, %v692_v59  ;;  %v1134_v58 = vld [vmem:[%s3162_s6 + $0x8] sm:$0xff] }
 0xc2a   :  { %v2975_v59 = vpack.c.bf16 %v1134_v58, %v1133_v2 }
 0xc2b   :  { %696 = vrot.lane.b32.xlu1 %v694_v60, %s2680_s22  ;;  %v1135_v60 = vld [vmem:[%s3162_s6 + $0x10] sm:$0xff] }
 0xc9d   :  { %v697_v61 = vpop.permute.xlu1 %696 }
 0xc9e   :  { %v699_v5 = vadd.f32 %v697_v61, %v176_v53  ;;  %v1136_v61 = vld [vmem:[%s3162_s6 + $0x18] sm:$0xff] }
 0xca0   :  { %2607 = vtanh.f32 %v699_v5  ;;  %v2985_v5 = vpack.c.bf16 %v1136_v61, %v1135_v60 }
 0xcaa   :  { %v2608_v6 = vpop.eup %2607 }
 0xcab   :  { %703 = vrot.lane.b32.xlu0 %v2608_v6, %s2681_s4 }
 0xd1d   :  { %v704_v9 = vpop.permute.xlu0 %703 }
 0xd1e   :  { %v706_v11 = vmul.f32 %v704_v9, %v701_v7 }
 0xd20   :  { %v708_v12 = vadd.f32 %v707_v63, %v706_v11 }
 0xd22   :  { %710 = vrot.lane.b32.xlu1 %v708_v12, %s2681_s4 }
 0xd94   :  { %v711_v14 = vpop.permute.xlu1 %710 }
 0xd95   :  { %2320 = vmatmul.mubr.msk.f32.vlgmr.msra.gmra.mrb[6].mxu1 %vm205_vm3, %v711_v14 }
 0xd96   :  { %2507 = vmatpush3.bf16.msra.mxu1 %v2763_v4  ;;  %2341 = vmatprep.mubr.msk.f32.mxu1 %vm2678_vm2, %v2679_v8 }
 0xd97   :  { %2508 = vmatprep.subr.bf16.mxu1 %v2677_v0 }
 0xd9a   :  { %2510 = vmatpush3.bf16.msra.mxu1 %v2783_v10 }
 0xd9b   :  { %2519 = vmatprep.subr.bf16.mxu1 %v2677_v0 }
 0xe68   :  { %v780_v15 = vpop.f32.mrb[6].mxu1 }
 0xe69   :  { %v781_v16 = vadd.f32 %v2804_v13, %v780_v15  ;;  %v2321_v18 = vpop.f32.mrb[7].mxu1 }
 0xe6b   :  { %792 = vrot.lane.b32.xlu0 %v781_v16, %s2680_s22  ;;  %v784_v20 = vadd.f32 %v781_v16, %v181_v19  ;;  %v3011_v16 = vld [vmem:[%s3163_s8] ss:$0 sm:$0xff] }
 0xe6d   :  { %v2102_v4 = vmul.f32 -1.442695, %v784_v20 }
 0xe6f   :  { %2609 = vpow2.f32 %v2102_v4  ;;  %v3018_v4 = vld [vmem:[%s3164_s7] ss:$0 sm:$0xff] }
 0xe79   :  { %v2610_v21 = vpop.eup %2609 }
 0xe7a   :  { %v788_v22 = vadd.f32 1.0, %v2610_v21 }
 0xe7c   :  { %2611 = vrcp.f32 %v788_v22 }
 0xe86   :  { %v2612_v23 = vpop.eup %2611 }
 0xe87   :  { %v802_v31 = vsub.f32 1.0, %v2612_v23  ;;  %v808_v33 = vmul.f32 %v2612_v23, %v708_v12 }
 0xedd   :  { %v793_v24 = vpop.permute.xlu0 %792 }
 0xede   :  { %v795_v10 = vmul.f32 %v2612_v23, %v793_v24 }
 0xee0   :  { %797 = vrot.lane.b32.xlu1 %v795_v10, %s2680_s22 }
 0xf52   :  { %v798_v25 = vpop.permute.xlu1 %797 }
 0xf53   :  { %v800_v26 = vadd.f32 %v798_v25, %v181_v19 }
 0xf55   :  { %2613 = vtanh.f32 %v800_v26 }
 0xf5f   :  { %v2614_v30 = vpop.eup %2613 }
 0xf60   :  { %804 = vrot.lane.b32.xlu0 %v2614_v30, %s2681_s4 }
 0xfd2   :  { %v805_v32 = vpop.permute.xlu0 %804 }
 0xfd3   :  { %v807_v35 = vmul.f32 %v805_v32, %v802_v31  ;;  %v191_v32 = vadd.f32 %v2863_v1, %v2811_v17 }
 0xfd5   :  { %v809_v36 = vadd.f32 %v808_v33, %v807_v35 }
 0xfd7   :  { %811 = vrot.lane.b32.xlu1 %v809_v36, %s2681_s4 }
0x1049   :  { %v812_v40 = vpop.permute.xlu1 %811 }
0x104a   :  { %2331 = vmatmul.mubr.msk.f32.vlgmr.msra.gmra.mrb[12].mxu0 %vm205_vm3, %v812_v40 }
0x104b   :  { %2514 = vmatpush3.bf16.msra.mxu0 %v2511_v29  ;;  %2352 = vmatprep.mubr.msk.f32.mxu0 %vm205_vm3, %v2817_v34 }
0x104c   :  { %2516 = vmatprep.subr.bf16.mxu0 %v2515_v39 }
0x104f   :  { %2518 = vmatpush3.bf16.msra.mxu0 %v2515_v39 }
0x1050   :  { %2531 = vmatprep.subr.bf16.mxu0 %v2677_v0 }
0x1052   :  { %2353 = vmatmul.mubr.msk.f32.vlgmr.msra.gmra.mrb[14].mxu0 %vm205_vm3, %v2867_v3 }
0x1053   :  { %2355 = vmatprep.mubr.msk.f32.mxu0 %vm205_vm3, %v2883_v28  ;;  %2533 = vmatpush3.bf16.msra.mxu0 %v2975_v59 }
0x1054   :  { %2534 = vmatprep.subr.bf16.mxu0 %v2677_v0 }
0x1056   :  { %2356 = vmatmul.mubr.msk.f32.gmra.mrb[16].mxu0 %vm205_vm3, %v2899_v49 }
0x1057   :  { %2358 = vmatprep.mubr.msk.f32.mxu0 %vm205_vm3, %v711_v14  ;;  %2536 = vmatpush3.bf16.msra.mxu0 %v2985_v5 }
0x1058   :  { %2543 = vmatprep.subr.bf16.mxu0 %v2677_v0 }
0x105a   :  { %2359 = vmatmul.mubr.msk.f32.gmra.mrb[18].mxu0 %vm205_vm3, %v812_v40 }
0x111d   :  { %v881_v41 = vpop.f32.mrb[12].mxu0 }
0x111e   :  { %v882_v34 = vadd.f32 %v2804_v13, %v881_v41  ;;  %v2332_v42 = vpop.f32.mrb[13].mxu0 }
0x1120   :  { %893 = vrot.lane.b32.xlu0 %v882_v34, %s2680_s22  ;;  %v885_v48 = vadd.f32 %v882_v34, %v186_v47 }
0x1122   :  { %v2104_v49 = vmul.f32 -1.442695, %v885_v48 }
0x1124   :  { %2615 = vpow2.f32 %v2104_v49 }
0x1125   :  { %v2955_v43 = vpop.f32.mrb[14].mxu0 }
0x1126   :  { %v1094_v44 = vpop.f32.mrb[15].mxu0  ;;  %v1100_v2 = vadd.f32 %v2955_v43, %v3018_v4 }
0x1127   :  { %v1095_v21 = vadd.f32 %v3018_v4, %v1094_v44 }
0x1129   :  { %v2957_v3 = vpop.f32.mrb[16].mxu0 }
0x112a   :  { %v2959_v45 = vpop.f32.mrb[17].mxu0 }
0x112d   :  { %v2961_v28 = vpop.f32.mrb[18].mxu0 }
0x112e   :  { %v2963_v46 = vpop.f32.mrb[19].mxu0  ;;  %v2616_v50 = vpop.eup %2615 }
0x112f   :  { %v889_v51 = vadd.f32 1.0, %v2616_v50 }
0x1131   :  { %2617 = vrcp.f32 %v889_v51 }
0x113b   :  { %v2618_v52 = vpop.eup %2617 }
0x113c   :  { %v903_v6 = vsub.f32 1.0, %v2618_v52  ;;  %v909_v9 = vmul.f32 %v2618_v52, %v809_v36 }
0x1192   :  { %v894_v53 = vpop.permute.xlu0 %893 }
0x1193   :  { %v896_v54 = vmul.f32 %v2618_v52, %v894_v53 }
0x1195   :  { %898 = vrot.lane.b32.xlu1 %v896_v54, %s2680_s22 }
0x1207   :  { %v899_v55 = vpop.permute.xlu1 %898 }
0x1208   :  { %v901_v56 = vadd.f32 %v899_v55, %v186_v47 }
0x120a   :  { %2619 = vtanh.f32 %v901_v56 }
0x1214   :  { %v2620_v57 = vpop.eup %2619 }
0x1215   :  { %905 = vrot.lane.b32.xlu0 %v2620_v57, %s2681_s4 }
0x1287   :  { %v906_v7 = vpop.permute.xlu0 %905 }
0x1288   :  { %v908_v63 = vmul.f32 %v906_v7, %v903_v6 }
0x128a   :  { %v2989_v11 = vadd.f32 %v909_v9, %v908_v63 }
0x128c   :  { %912 = vrot.lane.b32.xlu1 %v2989_v11, %s2681_s4 }
0x12fe   :  { %v913_v12 = vpop.permute.xlu1 %912 }
0x12ff   :  { %2342 = vmatmul.mubr.msk.f32.vlgmr.msra.gmra.mrb[8].mxu1 %vm205_vm3, %v913_v12  ;;  %2361 = vmatprep.mubr.msk.f32.mxu0 %vm205_vm3, %v913_v12 }
0x1300   :  { %2521 = vmatpush3.bf16.msra.mxu1 %v2975_v59  ;;  %2372 = vmatprep.mubr.msk.f32.mxu1 %vm2678_vm2, %v2679_v8 }
0x1301   :  { %2522 = vmatprep.subr.bf16.mxu1 %v2677_v0 }
0x1304   :  { %2524 = vmatpush3.bf16.msra.mxu1 %v2985_v5 }
0x1305   :  { %2525 = vmatprep.subr.bf16.mxu1 %v2677_v0 }
0x1307   :  { %2373 = vmatmul.mubr.f32.vlgmr.msra.gmra.mrb[10].mxu1 %v2679_v8 }
0x1308   :  { %2527 = vmatpush3.bf16.msra.mxu1 %v2975_v59  ;;  %2383 = vmatprep.mubr.msk.f32.mxu1 %vm2678_vm2, %v2679_v8 }
0x1309   :  { %2528 = vmatprep.subr.bf16.mxu1 %v2677_v0 }
0x130c   :  { %2530 = vmatpush3.bf16.msra.mxu1 %v2985_v5 }
0x130d   :  { %2537 = vmatprep.subr.bf16.mxu1 %v2677_v0 }
0x13d2   :  { %v982_v14 = vpop.f32.mrb[8].mxu1 }
0x13d3   :  { %v2343_v15 = vpop.f32.mrb[9].mxu1  ;;  %v983_v31 = vadd.f32 %v2804_v13, %v982_v14 }
0x13d5   :  { %v986_v33 = vadd.f32 %v983_v31, %v191_v32 }
0x13d7   :  { %v2106_v35 = vmul.f32 -1.442695, %v986_v33 }
0x13da   :  { %v1210_v18 = vpop.f32.mrb[10].mxu1 }
0x13db   :  { %v1211_v19 = vadd.f32 %v3011_v16, %v1210_v18  ;;  %v2374_v20 = vpop.f32.mrb[11].mxu1 }
0x13dd   :  { %1222 = vrot.lane.b32.xlu0 %v1211_v19, %s2680_s22  ;;  %v1214_v22 = vadd.f32 %v1211_v19, %v1095_v21 }
0x13df   :  { %v2117_v23 = vmul.f32 -1.442695, %v1214_v22 }
0x13e1   :  { %2621 = vpow2.f32 %v2117_v23 }
0x13eb   :  { %v2622_v24 = vpop.eup %2621 }
0x13ec   :  { %v1218_v10 = vadd.f32 1.0, %v2622_v24 }
0x13ee   :  { %2623 = vrcp.f32 %v1218_v10 }
0x13f8   :  { %v2624_v25 = vpop.eup %2623 }
0x13f9   :  { %v1232_v38 = vsub.f32 1.0, %v2624_v25  ;;  %v1238_v40 = vmul.f32 0.0, %v2624_v25 }
0x144f   :  { %v1223_v26 = vpop.permute.xlu0 %1222 }
0x1450   :  { %v1225_v27 = vmul.f32 %v2624_v25, %v1223_v26  ;;  %v1105_v26 = vadd.f32 %v3018_v4, %v2959_v45 }
0x1452   :  { %1227 = vrot.lane.b32.xlu1 %v1225_v27, %s2680_s22 }
0x14c4   :  { %v1228_v62 = vpop.permute.xlu1 %1227 }
0x14c5   :  { %v1230_v29 = vadd.f32 %v1228_v62, %v1095_v21 }
0x14c7   :  { %2625 = vtanh.f32 %v1230_v29 }
0x14c8   :  { %2627 = vpow2.f32 %v2106_v35 }
0x14d1   :  { %v2626_v30 = vpop.eup %2625 }
0x14d2   :  { %1234 = vrot.lane.b32.xlu0 %v2626_v30, %s2681_s4  ;;  %v2628_v36 = vpop.eup %2627 }
0x14d3   :  { %v990_v37 = vadd.f32 1.0, %v2628_v36 }
0x14d5   :  { %2629 = vrcp.f32 %v990_v37 }
0x14d6   :  { %994 = vrot.lane.b32.xlu0 %v983_v31, %s2680_s22 }
0x14df   :  { %v2630_v42 = vpop.eup %2629 }
0x14e0   :  { %v1004_v49 = vsub.f32 1.0, %v2630_v42  ;;  %v1010_v51 = vmul.f32 %v2630_v42, %v2989_v11 }
0x1544   :  { %v1235_v39 = vpop.permute.xlu0 %1234 }
0x1545   :  { %v1237_v41 = vmul.f32 %v1235_v39, %v1232_v38 }
0x1547   :  { %v1239_v34 = vadd.f32 %v1238_v40, %v1237_v41 }
0x1548   :  { %v995_v44 = vpop.permute.xlu0 %994 }
0x1549   :  { %v997_v47 = vmul.f32 %v2630_v42, %v995_v44  ;;  %1241 = vrot.lane.b32.xlu1 %v1239_v34, %s2681_s4 }
0x154b   :  { %999 = vrot.lane.b32.xlu0 %v997_v47, %s2680_s22 }
0x15bb   :  { %v1242_v13 = vpop.permute.xlu1 %1241 }
0x15bc   :  { %2384 = vmatmul.mubr.msk.f32.vlgmr.msra.gmra.mrb[12].mxu1 %vm205_vm3, %v1242_v13  ;;  %v1110_v13 = vadd.f32 %v2957_v3, %v3018_v4 }
0x15bd   :  { %v1000_v17 = vpop.permute.xlu0 %999  ;;  %2539 = vmatpush3.bf16.msra.mxu1 %v2975_v59  ;;  %2405 = vmatprep.mubr.msk.f32.mxu1 %vm2678_vm2, %v2679_v8 }
0x15be   :  { %v1002_v1 = vadd.f32 %v1000_v17, %v191_v32  ;;  %2540 = vmatprep.subr.bf16.mxu1 %v2677_v0 }
0x15c0   :  { %2631 = vtanh.f32 %v1002_v1 }
0x15c1   :  { %2542 = vmatpush3.bf16.msra.mxu1 %v2985_v5 }
0x15c2   :  { %2549 = vmatprep.subr.bf16.mxu1 %v2677_v0 }
0x15ca   :  { %v2632_v48 = vpop.eup %2631 }
0x15cb   :  { %1006 = vrot.lane.b32.xlu0 %v2632_v48, %s2681_s4 }
0x163d   :  { %v1007_v50 = vpop.permute.xlu0 %1006 }
0x163e   :  { %v1009_v52 = vmul.f32 %v1007_v50, %v1004_v49 }
0x1640   :  { %v1011_v53 = vadd.f32 %v1010_v51, %v1009_v52 }
0x1642   :  { %1024 = vrot.lane.b32.xlu0 %v1011_v53, %s2681_s4 }
0x168f   :  { %v1311_v54 = vpop.f32.mrb[12].mxu1 }
0x1690   :  { %v1312_v55 = vadd.f32 %v3011_v16, %v1311_v54  ;;  %v2385_v56 = vpop.f32.mrb[13].mxu1 }
0x1692   :  { %1323 = vrot.lane.b32.xlu1 %v1312_v55, %s2680_s22  ;;  %v1315_v58 = vadd.f32 %v1312_v55, %v1100_v2 }
0x1694   :  { %v2119_v60 = vmul.f32 -1.442695, %v1315_v58 }
0x1696   :  { %2633 = vpow2.f32 %v2119_v60 }
0x16a0   :  { %v2634_v61 = vpop.eup %2633 }
0x16a1   :  { %v1319_v6 = vadd.f32 1.0, %v2634_v61 }
0x16a3   :  { %2635 = vrcp.f32 %v1319_v6 }
0x16ad   :  { %v2636_v7 = vpop.eup %2635 }
0x16ae   :  { %v1333_v18 = vsub.f32 1.0, %v2636_v7  ;;  %v1339_v20 = vmul.f32 %v2636_v7, %v1239_v34 }
0x16b4   :  { %v1025_v57 = vpop.permute.xlu0 %1024 }
0x16b5   :  { %2362 = vmatmul.mubr.msk.f32.gmra.mrb[20].mxu0 %vm205_vm3, %v1025_v57 }
0x16b6   :  { %2394 = vmatprep.mubr.msk.f32.mxu0 %vm2678_vm2, %v2679_v8 }
0x1704   :  { %v1324_v9 = vpop.permute.xlu1 %1323 }
0x1705   :  { %v1326_v63 = vmul.f32 %v2636_v7, %v1324_v9  ;;  %v1115_v9 = vadd.f32 %v3018_v4, %v2963_v46 }
0x1707   :  { %1328 = vrot.lane.b32.xlu1 %v1326_v63, %s2680_s22 }
0x1779   :  { %v1329_v11 = vpop.permute.xlu1 %1328 }
0x177a   :  { %v1331_v12 = vadd.f32 %v1329_v11, %v1100_v2 }
0x177c   :  { %2637 = vtanh.f32 %v1331_v12 }
0x1786   :  { %v2638_v14 = vpop.eup %2637 }
0x1787   :  { %1335 = vrot.lane.b32.xlu1 %v2638_v14, %s2681_s4 }
0x1788   :  { %v3048_v15 = vpop.f32.mrb[20].mxu0 }
0x1789   :  { %v3050_v43 = vpop.f32.mrb[21].mxu0 }
0x17f9   :  { %v1336_v19 = vpop.permute.xlu1 %1335 }
0x17fa   :  { %v1338_v21 = vmul.f32 %v1336_v19, %v1333_v18 }
0x17fc   :  { %v1340_v22 = vadd.f32 %v1339_v20, %v1338_v21 }
0x17fe   :  { %1342 = vrot.lane.b32.xlu1 %v1340_v22, %s2681_s4 }
0x1870   :  { %v1343_v23 = vpop.permute.xlu1 %1342 }
0x1871   :  { %2395 = vmatmul.mubr.msk.f32.vlgmr.msra.gmra.mrb[22].mxu0 %vm205_vm3, %v1343_v23 }
0x1872   :  { %2545 = vmatpush3.bf16.msra.mxu0 %v2975_v59  ;;  %2416 = vmatprep.mubr.msk.f32.mxu0 %vm2678_vm2, %v2679_v8 }
0x1873   :  { %2546 = vmatprep.subr.bf16.mxu0 %v2677_v0 }
0x1876   :  { %2548 = vmatpush3.bf16.msra.mxu0 %v2985_v5 }
0x1877   :  { %2555 = vmatprep.subr.bf16.mxu0 %v2677_v0 }
0x1944   :  { %v1412_v24 = vpop.f32.mrb[22].mxu0 }
0x1945   :  { %v1413_v10 = vadd.f32 %v3011_v16, %v1412_v24  ;;  %v2396_v25 = vpop.f32.mrb[23].mxu0 }
0x1947   :  { %1424 = vrot.lane.b32.xlu0 %v1413_v10, %s2680_s22  ;;  %v1416_v27 = vadd.f32 %v1413_v10, %v1105_v26 }
0x1949   :  { %v2121_v62 = vmul.f32 -1.442695, %v1416_v27 }
0x194b   :  { %2639 = vpow2.f32 %v2121_v62 }
0x1955   :  { %v2640_v29 = vpop.eup %2639 }
0x1956   :  { %v1420_v30 = vadd.f32 1.0, %v2640_v29 }
0x1958   :  { %2641 = vrcp.f32 %v1420_v30 }
0x1962   :  { %v2642_v31 = vpop.eup %2641 }
0x1963   :  { %v1434_v38 = vsub.f32 1.0, %v2642_v31  ;;  %v1440_v45 = vmul.f32 %v2642_v31, %v1340_v22 }
0x19b9   :  { %v1425_v32 = vpop.permute.xlu0 %1424 }
0x19ba   :  { %v1427_v33 = vmul.f32 %v2642_v31, %v1425_v32  ;;  %v1120_v31 = vadd.f32 %v2961_v28, %v3018_v4 }
0x19bc   :  { %1429 = vrot.lane.b32.xlu1 %v1427_v33, %s2680_s22 }
0x1a2e   :  { %v1430_v35 = vpop.permute.xlu1 %1429 }
0x1a2f   :  { %v1432_v36 = vadd.f32 %v1430_v35, %v1105_v26 }
0x1a31   :  { %2643 = vtanh.f32 %v1432_v36 }
0x1a3b   :  { %v2644_v37 = vpop.eup %2643 }
0x1a3c   :  { %1436 = vrot.lane.b32.xlu0 %v2644_v37, %s2681_s4 }
0x1aae   :  { %v1437_v39 = vpop.permute.xlu0 %1436 }
0x1aaf   :  { %v1439_v40 = vmul.f32 %v1437_v39, %v1434_v38 }
0x1ab1   :  { %v1441_v41 = vadd.f32 %v1440_v45, %v1439_v40 }
0x1ab3   :  { %1443 = vrot.lane.b32.xlu1 %v1441_v41, %s2681_s4 }
0x1b25   :  { %v1444_v34 = vpop.permute.xlu1 %1443 }
0x1b26   :  { %2406 = vmatmul.mubr.msk.f32.vlgmr.msra.gmra.mrb[14].mxu1 %vm205_vm3, %v1444_v34 }
0x1b27   :  { %2551 = vmatpush3.bf16.msra.mxu1 %v2975_v59  ;;  %2427 = vmatprep.mubr.msk.f32.mxu1 %vm2678_vm2, %v2679_v8 }
0x1b28   :  { %2552 = vmatprep.subr.bf16.mxu1 %v2677_v0 }
0x1b2b   :  { %2554 = vmatpush3.bf16.msra.mxu1 %v2985_v5 }
0x1b2c   :  { %2561 = vmatprep.subr.bf16.mxu1 %v2677_v0 }
0x1bf9   :  { %v1513_v42 = vpop.f32.mrb[14].mxu1 }
0x1bfa   :  { %v1514_v44 = vadd.f32 %v3011_v16, %v1513_v42  ;;  %v2407_v47 = vpop.f32.mrb[15].mxu1 }
0x1bfc   :  { %1525 = vrot.lane.b32.xlu0 %v1514_v44, %s2680_s22  ;;  %v1517_v17 = vadd.f32 %v1514_v44, %v1110_v13 }
0x1bfe   :  { %v2123_v1 = vmul.f32 -1.442695, %v1517_v17 }
0x1c00   :  { %2645 = vpow2.f32 %v2123_v1  ;;  %v1125_v1 = vadd.f32 %v3018_v4, %v3050_v43 }
0x1c0a   :  { %v2646_v48 = vpop.eup %2645 }
0x1c0b   :  { %v1521_v49 = vadd.f32 1.0, %v2646_v48 }
0x1c0d   :  { %2647 = vrcp.f32 %v1521_v49 }
0x1c17   :  { %v2648_v50 = vpop.eup %2647 }
0x1c18   :  { %v1535_v56 = vsub.f32 1.0, %v2648_v50  ;;  %v1541_v3 = vmul.f32 %v2648_v50, %v1441_v41 }
0x1c6e   :  { %v1526_v51 = vpop.permute.xlu0 %1525 }
0x1c6f   :  { %v1528_v52 = vmul.f32 %v2648_v50, %v1526_v51 }
0x1c71   :  { %1530 = vrot.lane.b32.xlu1 %v1528_v52, %s2680_s22 }
0x1ce3   :  { %v1531_v53 = vpop.permute.xlu1 %1530 }
0x1ce4   :  { %v1533_v54 = vadd.f32 %v1531_v53, %v1110_v13 }
0x1ce6   :  { %2649 = vtanh.f32 %v1533_v54 }
0x1cf0   :  { %v2650_v55 = vpop.eup %2649 }
0x1cf1   :  { %1537 = vrot.lane.b32.xlu0 %v2650_v55, %s2681_s4 }
0x1d63   :  { %v1538_v57 = vpop.permute.xlu0 %1537 }
0x1d64   :  { %v1540_v2 = vmul.f32 %v1538_v57, %v1535_v56 }
0x1d66   :  { %v1542_v58 = vadd.f32 %v1541_v3, %v1540_v2 }
0x1d68   :  { %1544 = vrot.lane.b32.xlu1 %v1542_v58, %s2681_s4 }
0x1dda   :  { %v1545_v60 = vpop.permute.xlu1 %1544 }
0x1ddb   :  { %2417 = vmatmul.mubr.msk.f32.vlgmr.msra.gmra.mrb[24].mxu0 %vm205_vm3, %v1545_v60 }
0x1ddc   :  { %2557 = vmatpush3.bf16.msra.mxu0 %v2975_v59  ;;  %2438 = vmatprep.mubr.msk.f32.mxu0 %vm2678_vm2, %v2679_v8 }
0x1ddd   :  { %2558 = vmatprep.subr.bf16.mxu0 %v2677_v0 }
0x1de0   :  { %2560 = vmatpush3.bf16.msra.mxu0 %v2985_v5 }
0x1de1   :  { %2567 = vmatprep.subr.bf16.mxu0 %v2677_v0 }
0x1eae   :  { %v1614_v61 = vpop.f32.mrb[24].mxu0 }
0x1eaf   :  { %v1615_v6 = vadd.f32 %v3011_v16, %v1614_v61  ;;  %v2418_v7 = vpop.f32.mrb[25].mxu0 }
0x1eb1   :  { %1626 = vrot.lane.b32.xlu0 %v1615_v6, %s2680_s22  ;;  %v1618_v63 = vadd.f32 %v1615_v6, %v1115_v9 }
0x1eb3   :  { %v2125_v11 = vmul.f32 -1.442695, %v1618_v63 }
0x1eb5   :  { %2651 = vpow2.f32 %v2125_v11 }
0x1ebf   :  { %v2652_v12 = vpop.eup %2651 }
0x1ec0   :  { %v1622_v14 = vadd.f32 1.0, %v2652_v12 }
0x1ec2   :  { %2653 = vrcp.f32 %v1622_v14 }
0x1ecc   :  { %v2654_v18 = vpop.eup %2653 }
0x1ecd   :  { %v1636_v24 = vsub.f32 1.0, %v2654_v18  ;;  %v1642_v46 = vmul.f32 %v2654_v18, %v1542_v58 }
0x1f23   :  { %v1627_v19 = vpop.permute.xlu0 %1626 }
0x1f24   :  { %v1629_v20 = vmul.f32 %v2654_v18, %v1627_v19 }
0x1f26   :  { %1631 = vrot.lane.b32.xlu1 %v1629_v20, %s2680_s22 }
0x1f98   :  { %v1632_v21 = vpop.permute.xlu1 %1631 }
0x1f99   :  { %v1634_v22 = vadd.f32 %v1632_v21, %v1115_v9  ;;  %v1130_v9 = vadd.f32 %v3048_v15, %v3018_v4 }
0x1f9b   :  { %2655 = vtanh.f32 %v1634_v22 }
0x1fa5   :  { %v2656_v23 = vpop.eup %2655 }
0x1fa6   :  { %1638 = vrot.lane.b32.xlu0 %v2656_v23, %s2681_s4 }
0x2018   :  { %v1639_v10 = vpop.permute.xlu0 %1638 }
0x2019   :  { %v1641_v25 = vmul.f32 %v1639_v10, %v1636_v24 }
0x201b   :  { %v1643_v26 = vadd.f32 %v1642_v46, %v1641_v25 }
0x201d   :  { %1645 = vrot.lane.b32.xlu1 %v1643_v26, %s2681_s4 }
0x208f   :  { %v1646_v27 = vpop.permute.xlu1 %1645 }
0x2090   :  { %2428 = vmatmul.mubr.msk.f32.vlgmr.msra.gmra.mrb[16].mxu1 %vm205_vm3, %v1646_v27 }
0x2091   :  { %2563 = vmatpush3.bf16.msra.mxu1 %v2975_v59  ;;  %2449 = vmatprep.mubr.msk.f32.mxu1 %vm2678_vm2, %v2679_v8 }
0x2092   :  { %2564 = vmatprep.subr.bf16.mxu1 %v2677_v0 }
0x2095   :  { %2566 = vmatpush3.bf16.msra.mxu1 %v2985_v5 }
0x2163   :  { %v1715_v62 = vpop.f32.mrb[16].mxu1 }
0x2164   :  { %v1716_v29 = vadd.f32 %v3011_v16, %v1715_v62  ;;  %v2429_v30 = vpop.f32.mrb[17].mxu1 }
0x2166   :  { %1727 = vrot.lane.b32.xlu0 %v1716_v29, %s2680_s22  ;;  %v1719_v32 = vadd.f32 %v1716_v29, %v1120_v31 }
0x2168   :  { %v2127_v33 = vmul.f32 -1.442695, %v1719_v32 }
0x216a   :  { %2657 = vpow2.f32 %v2127_v33  ;;  %v2133_v33 = vld [vmem:[%s3166_s10] ss:$0 sm:$0xff] }
0x2174   :  { %v2658_v59 = vpop.eup %2657 }
0x2175   :  { %v1723_v35 = vadd.f32 1.0, %v2658_v59  ;;  %v1989_v59 = vld [vmem:[%s3167_s11] sm:$0xff] }
0x2177   :  { %2659 = vrcp.f32 %v1723_v35  ;;  %v1990_v35 = vld [vmem:[%s3167_s11 + $0x8] sm:$0xff] }
0x2181   :  { %v2660_v36 = vpop.eup %2659 }
0x2182   :  { %v1737_v40 = vsub.f32 1.0, %v2660_v36  ;;  %v1743_v28 = vmul.f32 %v2660_v36, %v1643_v26  ;;  %v2132_v26 = vld [vmem:[%s3165_s9] ss:$0 sm:$0xff] }
0x21d8   :  { %v1728_v37 = vpop.permute.xlu0 %1727 }
0x21d9   :  { %v1730_v38 = vmul.f32 %v2660_v36, %v1728_v37  ;;  %v1991_v36 = vld [vmem:[%s3167_s11 + $0x10] sm:$0xff]  ;;  %v2568_v37 = vpack.c.bf16 %v1990_v35, %v1989_v59 }
0x21db   :  { %1732 = vrot.lane.b32.xlu1 %v1730_v38, %s2680_s22  ;;  %v1992_v38 = vld [vmem:[%s3167_s11 + $0x18] sm:$0xff] }
0x224d   :  { %v1733_v5 = vpop.permute.xlu1 %1732 }
0x224e   :  { %v1735_v39 = vadd.f32 %v1733_v5, %v1120_v31  ;;  %v2571_v5 = vpack.c.bf16 %v1992_v38, %v1991_v36 }
0x2250   :  { %2661 = vtanh.f32 %v1735_v39 }
0x225a   :  { %v2662_v45 = vpop.eup %2661 }
0x225b   :  { %1739 = vrot.lane.b32.xlu0 %v2662_v45, %s2681_s4 }
0x22cd   :  { %v1740_v41 = vpop.permute.xlu0 %1739 }
0x22ce   :  { %v1742_v34 = vmul.f32 %v1740_v41, %v1737_v40 }
0x22d0   :  { %v1744_v42 = vadd.f32 %v1743_v28, %v1742_v34 }
0x22d2   :  { %1746 = vrot.lane.b32.xlu1 %v1744_v42, %s2681_s4 }
0x2344   :  { %v1747_v44 = vpop.permute.xlu1 %1746 }
0x2345   :  { %2439 = vmatmul.mubr.msk.f32.vlgmr.msra.gmra.mrb[26].mxu0 %vm205_vm3, %v1747_v44 }
0x2346   :  { %2460 = vmatprep.mubr.msk.f32.mxu0 %vm2678_vm2, %v2679_v8  ;;  %2569 = vmatpush3.bf16.msra.mxu0 %v2568_v37 }
0x2347   :  { %2570 = vmatprep.subr.bf16.mxu0 %v2677_v0  ;;  %v2134_v0 = vld [vmem:[%s3168_s12] ss:$0 sm:$0xff] }
0x234a   :  { %2572 = vmatpush3.bf16.msra.mxu0 %v2571_v5 }
0x2418   :  { %v1816_v47 = vpop.f32.mrb[26].mxu0 }
0x2419   :  { %v1817_v13 = vadd.f32 %v3011_v16, %v1816_v47  ;;  %v2440_v17 = vpop.f32.mrb[27].mxu0 }
0x241b   :  { %1828 = vrot.lane.b32.xlu0 %v1817_v13, %s2680_s22  ;;  %v1820_v48 = vadd.f32 %v1817_v13, %v1125_v1 }
0x241d   :  { %v2129_v49 = vmul.f32 -1.442695, %v1820_v48 }
0x241f   :  { %2663 = vpow2.f32 %v2129_v49 }
0x2429   :  { %v2664_v50 = vpop.eup %2663 }
0x242a   :  { %v1824_v51 = vadd.f32 1.0, %v2664_v50 }
0x242c   :  { %2665 = vrcp.f32 %v1824_v51 }
0x2436   :  { %v2666_v52 = vpop.eup %2665 }
0x2437   :  { %v1838_v57 = vsub.f32 1.0, %v2666_v52  ;;  %v1844_v43 = vmul.f32 %v2666_v52, %v1744_v42 }
0x248d   :  { %v1829_v53 = vpop.permute.xlu0 %1828 }
0x248e   :  { %v1831_v54 = vmul.f32 %v2666_v52, %v1829_v53 }
0x2490   :  { %1833 = vrot.lane.b32.xlu1 %v1831_v54, %s2680_s22 }
0x2502   :  { %v1834_v8 = vpop.permute.xlu1 %1833 }
0x2503   :  { %v1836_v55 = vadd.f32 %v1834_v8, %v1125_v1 }
0x2505   :  { %2667 = vtanh.f32 %v1836_v55 }
0x250f   :  { %v2668_v56 = vpop.eup %2667 }
0x2510   :  { %1840 = vrot.lane.b32.xlu0 %v2668_v56, %s2681_s4 }
0x2582   :  { %v1841_v3 = vpop.permute.xlu0 %1840 }
0x2583   :  { %v1843_v2 = vmul.f32 %v1841_v3, %v1838_v57 }
0x2585   :  { %v1845_v58 = vadd.f32 %v1844_v43, %v1843_v2 }
0x2587   :  { %1847 = vrot.lane.b32.xlu1 %v1845_v58, %s2681_s4 }
0x25f9   :  { %v1848_v60 = vpop.permute.xlu1 %1847 }
0x25fa   :  { %2450 = vmatmul.mubr.msk.f32.vlgmr.msra.gmra.mrb[18].mxu1 %vm205_vm3, %v1848_v60 }
0x26cd   :  { %v1917_v61 = vpop.f32.mrb[18].mxu1 }
0x26ce   :  { %v1918_v6 = vadd.f32 %v3011_v16, %v1917_v61  ;;  %v2451_v7 = vpop.f32.mrb[19].mxu1 }
0x26d0   :  { %1929 = vrot.lane.b32.xlu0 %v1918_v6, %s2680_s22  ;;  %v1921_v63 = vadd.f32 %v1918_v6, %v1130_v9 }
0x26d2   :  { %v2131_v11 = vmul.f32 -1.442695, %v1921_v63 }
0x26d4   :  { %2669 = vpow2.f32 %v2131_v11 }
0x26de   :  { %v2670_v12 = vpop.eup %2669 }
0x26df   :  { %v1925_v14 = vadd.f32 1.0, %v2670_v12 }
0x26e1   :  { %2671 = vrcp.f32 %v1925_v14 }
0x26eb   :  { %v2672_v18 = vpop.eup %2671 }
0x26ec   :  { %v1939_v23 = vsub.f32 1.0, %v2672_v18  ;;  %v1945_v4 = vmul.f32 %v2672_v18, %v1845_v58 }
0x2742   :  { %v1930_v19 = vpop.permute.xlu0 %1929 }
0x2743   :  { %v1932_v20 = vmul.f32 %v2672_v18, %v1930_v19 }
0x2745   :  { %1934 = vrot.lane.b32.xlu1 %v1932_v20, %s2680_s22  ;;  %s2682_s22 = smov 32  }
0x27b7   :  { %v1935_v21 = vpop.permute.xlu1 %1934 }
0x27b8   :  { %v1937_v22 = vadd.f32 %v1935_v21, %v1130_v9 }
0x27ba   :  { %2673 = vtanh.f32 %v1937_v22 }
0x27c4   :  { %v2674_v16 = vpop.eup %2673 }
0x27c5   :  { %1941 = vrot.lane.b32.xlu0 %v2674_v16, %s2681_s4 }
0x2837   :  { %v1942_v24 = vpop.permute.xlu0 %1941 }
0x2838   :  { %v1944_v15 = vmul.f32 %v1942_v24, %v1939_v23 }
0x283a   :  { %v1946_v10 = vadd.f32 %v1945_v4, %v1944_v15 }
0x283c   :  { %1948 = vrot.lane.b32.xlu1 %v1946_v10, %s2681_s4 }
0x28ae   :  { %v1949_v46 = vpop.permute.xlu1 %1948 }
0x28af   :  { %v1951_v25 = vsel %vm205_vm3, %v1949_v46, 0.0 }
0x28b0   :  { %1952 = vadd.xlane.f32.xlu0 %v1951_v25 }
0x28c6   :  { %1975 = vrot.lane.b32.xlu0 %v2132_v26, %s2682_s22 }
0x293d   :  { %v1953_v27 = vpop.xlane.xlu0 %1952 }
0x293e   :  { %v1955_v62 = vmul.f32 0.03125, %v1953_v27 }
0x2940   :  { %v1956_v29 = vsub.f32 %v1946_v10, %v1955_v62 }
0x2941   :  { %v1976_v28 = vpop.permute.xlu0 %1975 }
0x2942   :  { %v1957_v30 = vmul.f32 %v1956_v29, %v1956_v29 }
0x2944   :  { %1959 = vrot.lane.b32.xlu1 %v1957_v30, %s2681_s4 }
0x29b6   :  { %v1960_v31 = vpop.permute.xlu1 %1959 }
0x29b7   :  { %v1962_v32 = vsel %vm205_vm3, %v1960_v31, 0.0 }
0x29b8   :  { %1963 = vadd.xlane.f32.xlu1 %v1962_v32 }
0x29c9   :  { %1985 = vrot.lane.b32.xlu1 %v2133_v33, %s2682_s22 }
0x2a45   :  { %v1964_v39 = vpop.xlane.xlu1 %1963 }
0x2a46   :  { %v1965_v45 = vmul.f32 0.03125, %v1964_v39 }
0x2a48   :  { %v1966_v40 = vadd.f32 1e-05, %v1965_v45 }
0x2a49   :  { %v1986_v42 = vpop.permute.xlu1 %1985 }
0x2a4a   :  { %2675 = vrsqrt.f32 %v1966_v40 }
0x2a54   :  { %v2676_v41 = vpop.eup %2675 }
0x2a55   :  { %v1968_v34 = vmul.f32 %v2676_v41, %v1956_v29 }
0x2a57   :  { %v1978_v44 = vmul.f32 %v1976_v28, %v1968_v34 }
0x2a59   :  { %v1988_v47 = vadd.f32 %v1986_v42, %v1978_v44 }
0x2a5b   :  { %2001 = vrot.lane.b32.xlu0 %v1988_v47, %s2681_s4 }
0x2acd   :  { %v2002_v13 = vpop.permute.xlu0 %2001 }
0x2ace   :  { %2461 = vmatmul.mubr.msk.f32.vlgmr.msra.gmra.mrb[28].mxu0 %vm205_vm3, %v2002_v13 }
0x2ba1   :  { %v2071_v17 = vpop.f32.mrb[28].mxu0 }
0x2ba2   :  { %v2072_v1 = vadd.f32 %v2134_v0, %v2071_v17  ;;  %v2462_v48 = vpop.f32.mrb[29].mxu0 }
0x2ba4   :  { %2076 = vst.msk [vmem:[%s3169_s13] sm:$0xff] %vm2075_vm4, %v2072_v1 }

</bundles_post_ra>
